<compile_context>
chip_gen: v5e
topology: v5e:2x2
jax: 0.10.0
libtpu: 0.0.40
codegen_flags: <defaults>
</compile_context>

<pallas_src>
import functools

import jax
import jax.numpy as jnp
from jax.experimental import pallas as pl
from jax.experimental.pallas import tpu as pltpu


def _round_up(x, m):
    return (x + m - 1) // m * m


def _cnnblock_kernel(x_ref, xh_ref, w_ref, b_ref, o_ref, acc_ref, *,
                     TH, W, Wpp, Cp, Coutp, K):
    """One (batch, H-tile) step: conv + folded-BN bias + LeakyReLU(0.1).

    x_ref  : (TH,  Wpp, Cp)     bf16  main input rows  [h*TH,    h*TH+TH)      (padded coords)
    xh_ref : (K-1, Wpp, Cp)     bf16  halo input rows  [h*TH+TH, h*TH+TH+K-1)
    w_ref  : (K, Cp, K*Coutp)   bf16  weight slab: w_ref[kh][ci, kw*Coutp+co]
                                      = conv_w[kh, kw, ci, co] * bn_scale[co]
    b_ref  : (1, Coutp)         f32   folded BN bias
    o_ref  : (TH, W, Coutp)     bf16  output tile (lane-dense Coutp)
    acc_ref: (TH, W, Coutp)     f32   VMEM accumulator scratch
    """
    if K > 1:
        x_full = jnp.concatenate([x_ref[...], xh_ref[...]], axis=0)   # (TH+K-1, Wpp, Cp)
    else:
        x_full = x_ref[...]

    # K matmuls, one per kh; kw is folded into the matmul N dimension (K*Coutp lanes).
    # The kw column fix-up (128-aligned lane slice + small sublane shift) is applied per
    # kh directly into the small (TH, W, Coutp) accumulator, so the wide
    # (TH*Wpp, K*Coutp) matmul result never persists in VMEM.
    first = True
    for kh in range(K):
        lhs = x_full[kh:kh + TH].reshape(TH * Wpp, Cp)
        contrib = jnp.dot(lhs, w_ref[kh], preferred_element_type=jnp.float32)
        contrib = contrib.reshape(TH, Wpp, K * Coutp)
        for kw in range(K):
            part = contrib[:, kw:kw + W, kw * Coutp:(kw + 1) * Coutp]
            if first:
                acc_ref[...] = part
                first = False
            else:
                acc_ref[...] += part

    y = acc_ref[...] + b_ref[...]          # folded BN bias (lane broadcast)
    y = jnp.maximum(y, 0.1 * y)            # LeakyReLU(0.1): mul+max, no select
    o_ref[...] = y.astype(o_ref.dtype)


def _conv_bn_leaky_nhwc(x_p, w_slab, bias_p, *, H_pad, W, TH, K, out_dtype):
    """Padded-NHWC native entry point (chain CNNBlocks through this to avoid per-block
    NCHW<->NHWC transposes; padded Cout lanes stay zero-weighted in the next layer).

    x_p    : (N, H_pad + K - 1, Wpp, Cp)  compute dtype, zero padded (H halo, W, C)
    w_slab : (K, Cp, K*Coutp)             compute dtype, BN scale folded in
    bias_p : (1, Coutp)                   f32 folded BN bias
    returns: (N, H_pad, W, Coutp)         out_dtype
    """
    N, _, Wpp, Cp = x_p.shape
    Coutp = bias_p.shape[1]
    nH = H_pad // TH
    KH = K - 1 if K > 1 else 1

    kernel = functools.partial(_cnnblock_kernel, TH=TH, W=W, Wpp=Wpp,
                               Cp=Cp, Coutp=Coutp, K=K)

    in_bytes = jnp.dtype(x_p.dtype).itemsize
    out_bytes = jnp.dtype(out_dtype).itemsize
    # VMEM budget from the actual block sizes: double-buffered input/output streams,
    # single-buffered constants, f32 accumulator scratch, + headroom.
    need = (2 * ((TH + KH) * Wpp * Cp * in_bytes + TH * W * Coutp * out_bytes)
            + w_slab.size * in_bytes + bias_p.size * 4 + TH * W * Coutp * 4)
    vmem_limit = int(min(max(need + 16 * 2**20, 32 * 2**20), 100 * 2**20))

    cost = pl.CostEstimate(
        flops=2 * N * H_pad * W * K * K * Cp * Coutp,
        transcendentals=0,
        bytes_accessed=(x_p.size * in_bytes + w_slab.size * in_bytes
                        + bias_p.size * 4 + N * H_pad * W * Coutp * out_bytes))

    if K > 1:
        halo_map = lambda n, h: (n, (h + 1) * (TH // KH), 0, 0)   # element offset (h+1)*TH
    else:
        halo_map = lambda n, h: (n, 0, 0, 0)                      # unused when K == 1

    out = pl.pallas_call(
        kernel,
        out_shape=jax.ShapeDtypeStruct((N, H_pad, W, Coutp), out_dtype),
        grid_spec=pltpu.PrefetchScalarGridSpec(
            num_scalar_prefetch=0,
            grid=(N, nH),
            in_specs=[
                # main TH rows of the current tile (non-overlapping blocked window)
                pl.BlockSpec((None, TH, Wpp, Cp), lambda n, h: (n, h, 0, 0)),
                # (K-1)-row halo just below the tile: overlap expressed in the BlockSpec,
                # no wrapper-side duplication / extra HBM pass
                pl.BlockSpec((None, KH, Wpp, Cp), halo_map),
                # constants: whole-array resident in VMEM, single-buffered (no 2x slab)
                pl.BlockSpec(memory_space=pltpu.MemorySpace.VMEM),
                pl.BlockSpec(memory_space=pltpu.MemorySpace.VMEM),
            ],
            out_specs=pl.BlockSpec((None, TH, W, Coutp), lambda n, h: (n, h, 0, 0)),
            scratch_shapes=[pltpu.VMEM((TH, W, Coutp), jnp.float32)],
        ),
        compiler_params=pltpu.CompilerParams(
            dimension_semantics=("parallel", "parallel"),
            vmem_limit_bytes=vmem_limit),
        cost_estimate=cost,
    )(x_p, x_p, w_slab, bias_p)
    return out


def cnn_block(x_nchw, w_oihw, gamma, beta, running_mean, running_var, *,
              eps=1e-5, padding=1, tile_h=16, compute_dtype=jnp.bfloat16):
    """CNNBlock forward (bn_act=True). x_nchw: (N, C, H, W) float32, returns NCHW f32."""
    N, C, H, W = x_nchw.shape
    Cout, C2, K, K2 = w_oihw.shape
    assert C2 == C and K2 == K
    assert K % 2 == 1 and padding == (K - 1) // 2, "kernel assumes stride-1 'same' conv"

    LANE, SUB = 128, 8
    Cp = _round_up(C, SUB)              # input channels -> sublane-friendly rhs
    Coutp = _round_up(Cout, LANE)       # output channels -> lane-dense stores / MXU N
    TH = max(1, min(tile_h, H))         # H-tile rows per grid step
    if K > 1:
        TH = _round_up(TH, K - 1)       # halo BlockSpec needs TH % (K-1) == 0
    H_pad = _round_up(H, TH)
    Wp = W + 2 * padding
    Wpp = _round_up(Wp, SUB)
    f32 = jnp.float32

    # ---- BN folding (eval mode): y = conv(x) * scale + bias ------------------
    scale = (gamma / jnp.sqrt(running_var + eps)).astype(f32)          # (Cout,)
    bias = (beta - running_mean * scale).astype(f32)                   # (Cout,)

    # ---- weights: OIHW -> HWIO, fold scale, pad channels, pack as slab -------
    w_hwio = jnp.transpose(w_oihw.astype(f32), (2, 3, 1, 0)) * scale   # (K,K,C,Cout)
    w_hwio = jnp.pad(w_hwio, ((0, 0), (0, 0), (0, Cp - C), (0, Coutp - Cout)))
    # slab[kh, ci, kw*Coutp + co] = w[kh, kw, ci, co] * scale[co]
    w_slab = jnp.transpose(w_hwio, (0, 2, 1, 3)).reshape(K, Cp, K * Coutp)
    w_slab = w_slab.astype(compute_dtype)
    bias_p = jnp.pad(bias, (0, Coutp - Cout)).reshape(1, Coutp)

    # ---- input: NCHW -> padded NHWC (boundary-only; chained blocks should stay NHWC)
    x_nhwc = jnp.transpose(x_nchw, (0, 2, 3, 1)).astype(f32)
    x_p = jnp.pad(x_nhwc,
                  ((0, 0),
                   (padding, padding + (H_pad - H)),
                   (padding, padding + (Wpp - Wp)),
                   (0, Cp - C))).astype(compute_dtype)

    out_nhwc = _conv_bn_leaky_nhwc(x_p, w_slab, bias_p,
                                   H_pad=H_pad, W=W, TH=TH, K=K,
                                   out_dtype=compute_dtype)

    # unpad and return in PyTorch NCHW convention (module-boundary cast back to f32)
    return jnp.transpose(out_nhwc[:, :H, :, :Cout], (0, 3, 1, 2)).astype(x_nchw.dtype)


def _reference(x_nchw, w_oihw, gamma, beta, mean, var, eps=1e-5, padding=1):
    y = jax.lax.conv_general_dilated(
        x_nchw, w_oihw, window_strides=(1, 1),
        padding=[(padding, padding), (padding, padding)],
        dimension_numbers=("NCHW", "OIHW", "NCHW"))
    inv = 1.0 / jnp.sqrt(var + eps)
    y = (y - mean[None, :, None, None]) * inv[None, :, None, None]
    y = y * gamma[None, :, None, None] + beta[None, :, None, None]
    return jnp.where(y >= 0, y, 0.1 * y)


if __name__ == "__main__":
    key = jax.random.PRNGKey(0)
    k_x, k_w, k_g, k_b, k_m, k_v = jax.random.split(key, 6)

    N, Cin, Cout, H, W, K = 2, 4, 8, 16, 16, 3

    x = jax.random.normal(k_x, (N, Cin, H, W), dtype=jnp.float32)
    w = jax.random.normal(k_w, (Cout, Cin, K, K), dtype=jnp.float32) * 0.1
    gamma = jax.random.normal(k_g, (Cout,), dtype=jnp.float32) * 0.1 + 1.0
    beta = jax.random.normal(k_b, (Cout,), dtype=jnp.float32) * 0.1
    running_mean = jax.random.normal(k_m, (Cout,), dtype=jnp.float32) * 0.1
    running_var = jnp.abs(jax.random.normal(k_v, (Cout,), dtype=jnp.float32)) * 0.1 + 1.0

    out = cnn_block(x, w, gamma, beta, running_mean, running_var)
    out = jax.block_until_ready(out)

    ref = _reference(x, w, gamma, beta, running_mean, running_var)
    assert out.shape == (N, Cout, H, W)
    # bf16 matmul operands + bf16 output store (f32 accumulation) -> loosened tolerance.
    assert jnp.allclose(out, ref, atol=5e-2, rtol=5e-2)

    print("KERNEL_OK")
</pallas_src>

<mosaic_0001>
module attributes {stable_mosaic.version = 11 : i64} {
  func.func @_cnnblock_kernel(%arg0: i32, %arg1: i32, %arg2: memref<1x16x24x8xbf16, #tpu.memory_space<vmem>>, %arg3: memref<1x2x24x8xbf16, #tpu.memory_space<vmem>>, %arg4: memref<3x8x384xbf16, #tpu.memory_space<vmem>>, %arg5: memref<1x128xf32, #tpu.memory_space<vmem>>, %arg6: memref<1x16x16x128xbf16, #tpu.memory_space<vmem>>, %arg7: memref<16x16x128xf32, #tpu.memory_space<vmem>>) attributes {dimension_semantics = [#tpu.dimension_semantics<parallel>, #tpu.dimension_semantics<parallel>], iteration_bounds = array<i64: 2, 1>, scalar_prefetch = 0 : i64, scratch_operands = 1 : i64, tpu.core_type = #tpu.core_type<tc>, window_params = [{transform_indices = @transform_0, window_bounds = array<i64: 1, 16, 24, 8>}, {transform_indices = @transform_1, window_bounds = array<i64: 1, 2, 24, 8>}, {pipeline_mode = #tpu.pipeline_mode<synchronous>, transform_indices = @transform_2, window_bounds = array<i64: 3, 8, 384>}, {pipeline_mode = #tpu.pipeline_mode<synchronous>, transform_indices = @transform_3, window_bounds = array<i64: 1, 128>}, {transform_indices = @transform_4, window_bounds = array<i64: 1, 16, 16, 128>}]} {
    %c0 = arith.constant 0 : index
    %c0_0 = arith.constant 0 : index
    %c0_1 = arith.constant 0 : index
    %c0_2 = arith.constant 0 : index
    %0 = vector.load %arg2[%c0, %c0_0, %c0_1, %c0_2] : memref<1x16x24x8xbf16, #tpu.memory_space<vmem>>, vector<1x16x24x8xbf16>
    %1 = vector.shape_cast %0 : vector<1x16x24x8xbf16> to vector<16x24x8xbf16>
    %c0_3 = arith.constant 0 : index
    %c0_4 = arith.constant 0 : index
    %c0_5 = arith.constant 0 : index
    %c0_6 = arith.constant 0 : index
    %2 = vector.load %arg3[%c0_3, %c0_4, %c0_5, %c0_6] : memref<1x2x24x8xbf16, #tpu.memory_space<vmem>>, vector<1x2x24x8xbf16>
    %3 = vector.shape_cast %2 : vector<1x2x24x8xbf16> to vector<2x24x8xbf16>
    %4 = tpu.concatenate %1, %3 in 0 : vector<16x24x8xbf16>, vector<2x24x8xbf16> -> vector<18x24x8xbf16>
    %5 = vector.extract_strided_slice %4 {offsets = [0, 0, 0], sizes = [16, 24, 8], strides = [1, 1, 1]} : vector<18x24x8xbf16> to vector<16x24x8xbf16>
    %6 = vector.shape_cast %5 : vector<16x24x8xbf16> to vector<384x8xbf16>
    %c0_7 = arith.constant 0 : index
    %c0_8 = arith.constant 0 : index
    %c0_9 = arith.constant 0 : index
    %7 = vector.load %arg4[%c0_7, %c0_8, %c0_9] : memref<3x8x384xbf16, #tpu.memory_space<vmem>>, vector<1x8x384xbf16>
    %8 = vector.shape_cast %7 : vector<1x8x384xbf16> to vector<8x384xbf16>
    %cst = arith.constant dense<0.000000e+00> : vector<384x384xf32>
    %9 = tpu.matmul %6, %8, %cst {dimension_numbers = #tpu.dot_dimension_numbers<[1], [0], [0], [1], [0, 0, 1, 1], [], []>} : vector<384x8xbf16>, vector<8x384xbf16>, vector<384x384xf32> -> vector<384x384xf32>
    %10 = vector.shape_cast %9 : vector<384x384xf32> to vector<16x24x384xf32>
    %11 = vector.extract_strided_slice %10 {offsets = [0, 0, 0], sizes = [16, 16, 128], strides = [1, 1, 1]} : vector<16x24x384xf32> to vector<16x16x128xf32>
    %c0_10 = arith.constant 0 : index
    %c0_11 = arith.constant 0 : index
    %c0_12 = arith.constant 0 : index
    %12 = vector.load %arg7[%c0_10, %c0_11, %c0_12] : memref<16x16x128xf32, #tpu.memory_space<vmem>>, vector<16x16x128xf32>
    tpu.vector_store %arg7[%c0_10, %c0_11, %c0_12], %11 {strides = array<i32>} : memref<16x16x128xf32, #tpu.memory_space<vmem>>, vector<16x16x128xf32>,
    %13 = vector.extract_strided_slice %10 {offsets = [0, 1, 128], sizes = [16, 16, 128], strides = [1, 1, 1]} : vector<16x24x384xf32> to vector<16x16x128xf32>
    %c0_13 = arith.constant 0 : index
    %c0_14 = arith.constant 0 : index
    %c0_15 = arith.constant 0 : index
    %14 = vector.load %arg7[%c0_13, %c0_14, %c0_15] : memref<16x16x128xf32, #tpu.memory_space<vmem>>, vector<16x16x128xf32>
    %15 = arith.addf %14, %13 : vector<16x16x128xf32>
    %c0_16 = arith.constant 0 : index
    %c0_17 = arith.constant 0 : index
    %c0_18 = arith.constant 0 : index
    %16 = vector.load %arg7[%c0_16, %c0_17, %c0_18] : memref<16x16x128xf32, #tpu.memory_space<vmem>>, vector<16x16x128xf32>
    tpu.vector_store %arg7[%c0_16, %c0_17, %c0_18], %15 {strides = array<i32>} : memref<16x16x128xf32, #tpu.memory_space<vmem>>, vector<16x16x128xf32>,
    %17 = vector.extract_strided_slice %10 {offsets = [0, 2, 256], sizes = [16, 16, 128], strides = [1, 1, 1]} : vector<16x24x384xf32> to vector<16x16x128xf32>
    %c0_19 = arith.constant 0 : index
    %c0_20 = arith.constant 0 : index
    %c0_21 = arith.constant 0 : index
    %18 = vector.load %arg7[%c0_19, %c0_20, %c0_21] : memref<16x16x128xf32, #tpu.memory_space<vmem>>, vector<16x16x128xf32>
    %19 = arith.addf %18, %17 : vector<16x16x128xf32>
    %c0_22 = arith.constant 0 : index
    %c0_23 = arith.constant 0 : index
    %c0_24 = arith.constant 0 : index
    %20 = vector.load %arg7[%c0_22, %c0_23, %c0_24] : memref<16x16x128xf32, #tpu.memory_space<vmem>>, vector<16x16x128xf32>
    tpu.vector_store %arg7[%c0_22, %c0_23, %c0_24], %19 {strides = array<i32>} : memref<16x16x128xf32, #tpu.memory_space<vmem>>, vector<16x16x128xf32>,
    %21 = vector.extract_strided_slice %4 {offsets = [1, 0, 0], sizes = [16, 24, 8], strides = [1, 1, 1]} : vector<18x24x8xbf16> to vector<16x24x8xbf16>
    %22 = vector.shape_cast %21 : vector<16x24x8xbf16> to vector<384x8xbf16>
    %c1 = arith.constant 1 : index
    %c0_25 = arith.constant 0 : index
    %c0_26 = arith.constant 0 : index
    %23 = vector.load %arg4[%c1, %c0_25, %c0_26] : memref<3x8x384xbf16, #tpu.memory_space<vmem>>, vector<1x8x384xbf16>
    %24 = vector.shape_cast %23 : vector<1x8x384xbf16> to vector<8x384xbf16>
    %cst_27 = arith.constant dense<0.000000e+00> : vector<384x384xf32>
    %25 = tpu.matmul %22, %24, %cst_27 {dimension_numbers = #tpu.dot_dimension_numbers<[1], [0], [0], [1], [0, 0, 1, 1], [], []>} : vector<384x8xbf16>, vector<8x384xbf16>, vector<384x384xf32> -> vector<384x384xf32>
    %26 = vector.shape_cast %25 : vector<384x384xf32> to vector<16x24x384xf32>
    %27 = vector.extract_strided_slice %26 {offsets = [0, 0, 0], sizes = [16, 16, 128], strides = [1, 1, 1]} : vector<16x24x384xf32> to vector<16x16x128xf32>
    %c0_28 = arith.constant 0 : index
    %c0_29 = arith.constant 0 : index
    %c0_30 = arith.constant 0 : index
    %28 = vector.load %arg7[%c0_28, %c0_29, %c0_30] : memref<16x16x128xf32, #tpu.memory_space<vmem>>, vector<16x16x128xf32>
    %29 = arith.addf %28, %27 : vector<16x16x128xf32>
    %c0_31 = arith.constant 0 : index
    %c0_32 = arith.constant 0 : index
    %c0_33 = arith.constant 0 : index
    %30 = vector.load %arg7[%c0_31, %c0_32, %c0_33] : memref<16x16x128xf32, #tpu.memory_space<vmem>>, vector<16x16x128xf32>
    tpu.vector_store %arg7[%c0_31, %c0_32, %c0_33], %29 {strides = array<i32>} : memref<16x16x128xf32, #tpu.memory_space<vmem>>, vector<16x16x128xf32>,
    %31 = vector.extract_strided_slice %26 {offsets = [0, 1, 128], sizes = [16, 16, 128], strides = [1, 1, 1]} : vector<16x24x384xf32> to vector<16x16x128xf32>
    %c0_34 = arith.constant 0 : index
    %c0_35 = arith.constant 0 : index
    %c0_36 = arith.constant 0 : index
    %32 = vector.load %arg7[%c0_34, %c0_35, %c0_36] : memref<16x16x128xf32, #tpu.memory_space<vmem>>, vector<16x16x128xf32>
    %33 = arith.addf %32, %31 : vector<16x16x128xf32>
    %c0_37 = arith.constant 0 : index
    %c0_38 = arith.constant 0 : index
    %c0_39 = arith.constant 0 : index
    %34 = vector.load %arg7[%c0_37, %c0_38, %c0_39] : memref<16x16x128xf32, #tpu.memory_space<vmem>>, vector<16x16x128xf32>
    tpu.vector_store %arg7[%c0_37, %c0_38, %c0_39], %33 {strides = array<i32>} : memref<16x16x128xf32, #tpu.memory_space<vmem>>, vector<16x16x128xf32>,
    %35 = vector.extract_strided_slice %26 {offsets = [0, 2, 256], sizes = [16, 16, 128], strides = [1, 1, 1]} : vector<16x24x384xf32> to vector<16x16x128xf32>
    %c0_40 = arith.constant 0 : index
    %c0_41 = arith.constant 0 : index
    %c0_42 = arith.constant 0 : index
    %36 = vector.load %arg7[%c0_40, %c0_41, %c0_42] : memref<16x16x128xf32, #tpu.memory_space<vmem>>, vector<16x16x128xf32>
    %37 = arith.addf %36, %35 : vector<16x16x128xf32>
    %c0_43 = arith.constant 0 : index
    %c0_44 = arith.constant 0 : index
    %c0_45 = arith.constant 0 : index
    %38 = vector.load %arg7[%c0_43, %c0_44, %c0_45] : memref<16x16x128xf32, #tpu.memory_space<vmem>>, vector<16x16x128xf32>
    tpu.vector_store %arg7[%c0_43, %c0_44, %c0_45], %37 {strides = array<i32>} : memref<16x16x128xf32, #tpu.memory_space<vmem>>, vector<16x16x128xf32>,
    %39 = vector.extract_strided_slice %4 {offsets = [2, 0, 0], sizes = [16, 24, 8], strides = [1, 1, 1]} : vector<18x24x8xbf16> to vector<16x24x8xbf16>
    %40 = vector.shape_cast %39 : vector<16x24x8xbf16> to vector<384x8xbf16>
    %c2 = arith.constant 2 : index
    %c0_46 = arith.constant 0 : index
    %c0_47 = arith.constant 0 : index
    %41 = vector.load %arg4[%c2, %c0_46, %c0_47] : memref<3x8x384xbf16, #tpu.memory_space<vmem>>, vector<1x8x384xbf16>
    %42 = vector.shape_cast %41 : vector<1x8x384xbf16> to vector<8x384xbf16>
    %cst_48 = arith.constant dense<0.000000e+00> : vector<384x384xf32>
    %43 = tpu.matmul %40, %42, %cst_48 {dimension_numbers = #tpu.dot_dimension_numbers<[1], [0], [0], [1], [0, 0, 1, 1], [], []>} : vector<384x8xbf16>, vector<8x384xbf16>, vector<384x384xf32> -> vector<384x384xf32>
    %44 = vector.shape_cast %43 : vector<384x384xf32> to vector<16x24x384xf32>
    %45 = vector.extract_strided_slice %44 {offsets = [0, 0, 0], sizes = [16, 16, 128], strides = [1, 1, 1]} : vector<16x24x384xf32> to vector<16x16x128xf32>
    %c0_49 = arith.constant 0 : index
    %c0_50 = arith.constant 0 : index
    %c0_51 = arith.constant 0 : index
    %46 = vector.load %arg7[%c0_49, %c0_50, %c0_51] : memref<16x16x128xf32, #tpu.memory_space<vmem>>, vector<16x16x128xf32>
    %47 = arith.addf %46, %45 : vector<16x16x128xf32>
    %c0_52 = arith.constant 0 : index
    %c0_53 = arith.constant 0 : index
    %c0_54 = arith.constant 0 : index
    %48 = vector.load %arg7[%c0_52, %c0_53, %c0_54] : memref<16x16x128xf32, #tpu.memory_space<vmem>>, vector<16x16x128xf32>
    tpu.vector_store %arg7[%c0_52, %c0_53, %c0_54], %47 {strides = array<i32>} : memref<16x16x128xf32, #tpu.memory_space<vmem>>, vector<16x16x128xf32>,
    %49 = vector.extract_strided_slice %44 {offsets = [0, 1, 128], sizes = [16, 16, 128], strides = [1, 1, 1]} : vector<16x24x384xf32> to vector<16x16x128xf32>
    %c0_55 = arith.constant 0 : index
    %c0_56 = arith.constant 0 : index
    %c0_57 = arith.constant 0 : index
    %50 = vector.load %arg7[%c0_55, %c0_56, %c0_57] : memref<16x16x128xf32, #tpu.memory_space<vmem>>, vector<16x16x128xf32>
    %51 = arith.addf %50, %49 : vector<16x16x128xf32>
    %c0_58 = arith.constant 0 : index
    %c0_59 = arith.constant 0 : index
    %c0_60 = arith.constant 0 : index
    %52 = vector.load %arg7[%c0_58, %c0_59, %c0_60] : memref<16x16x128xf32, #tpu.memory_space<vmem>>, vector<16x16x128xf32>
    tpu.vector_store %arg7[%c0_58, %c0_59, %c0_60], %51 {strides = array<i32>} : memref<16x16x128xf32, #tpu.memory_space<vmem>>, vector<16x16x128xf32>,
    %53 = vector.extract_strided_slice %44 {offsets = [0, 2, 256], sizes = [16, 16, 128], strides = [1, 1, 1]} : vector<16x24x384xf32> to vector<16x16x128xf32>
    %c0_61 = arith.constant 0 : index
    %c0_62 = arith.constant 0 : index
    %c0_63 = arith.constant 0 : index
    %54 = vector.load %arg7[%c0_61, %c0_62, %c0_63] : memref<16x16x128xf32, #tpu.memory_space<vmem>>, vector<16x16x128xf32>
    %55 = arith.addf %54, %53 : vector<16x16x128xf32>
    %c0_64 = arith.constant 0 : index
    %c0_65 = arith.constant 0 : index
    %c0_66 = arith.constant 0 : index
    %56 = vector.load %arg7[%c0_64, %c0_65, %c0_66] : memref<16x16x128xf32, #tpu.memory_space<vmem>>, vector<16x16x128xf32>
    tpu.vector_store %arg7[%c0_64, %c0_65, %c0_66], %55 {strides = array<i32>} : memref<16x16x128xf32, #tpu.memory_space<vmem>>, vector<16x16x128xf32>,
    %c0_67 = arith.constant 0 : index
    %c0_68 = arith.constant 0 : index
    %c0_69 = arith.constant 0 : index
    %57 = vector.load %arg7[%c0_67, %c0_68, %c0_69] : memref<16x16x128xf32, #tpu.memory_space<vmem>>, vector<16x16x128xf32>
    %c0_70 = arith.constant 0 : index
    %c0_71 = arith.constant 0 : index
    %58 = vector.load %arg5[%c0_70, %c0_71] : memref<1x128xf32, #tpu.memory_space<vmem>>, vector<1x128xf32>
    %59 = vector.shape_cast %58 : vector<1x128xf32> to vector<1x1x128xf32>
    %60 = vector.broadcast %59 : vector<1x1x128xf32> to vector<16x16x128xf32>
    %61 = arith.addf %57, %60 : vector<16x16x128xf32>
    %cst_72 = arith.constant 1.000000e-01 : f32
    %62 = vector.broadcast %cst_72 : f32 to vector<16x16x128xf32>
    %63 = arith.mulf %62, %61 : vector<16x16x128xf32>
    %64 = arith.maximumf %61, %63 : vector<16x16x128xf32>
    %65 = arith.truncf %64 : vector<16x16x128xf32> to vector<16x16x128xbf16>
    %c0_73 = arith.constant 0 : index
    %c0_74 = arith.constant 0 : index
    %c0_75 = arith.constant 0 : index
    %c0_76 = arith.constant 0 : index
    %66 = vector.load %arg6[%c0_73, %c0_74, %c0_75, %c0_76] : memref<1x16x16x128xbf16, #tpu.memory_space<vmem>>, vector<1x16x16x128xbf16>
    %67 = vector.shape_cast %66 : vector<1x16x16x128xbf16> to vector<16x16x128xbf16>
    %68 = vector.shape_cast %65 : vector<16x16x128xbf16> to vector<1x16x16x128xbf16>
    tpu.vector_store %arg6[%c0_73, %c0_74, %c0_75, %c0_76], %68 {strides = array<i32>} : memref<1x16x16x128xbf16, #tpu.memory_space<vmem>>, vector<1x16x16x128xbf16>,
    return
  }
  func.func @transform_0(%arg0: i32, %arg1: i32) -> (i32, i32, i32, i32) {
    %c0_i32 = arith.constant 0 : i32
    %c0_i32_0 = arith.constant 0 : i32
    %c0_i32_1 = arith.constant 0 : i32
    return %arg0, %arg1, %c0_i32, %c0_i32_0 : i32, i32, i32, i32
  }
  func.func @transform_1(%arg0: i32, %arg1: i32) -> (i32, i32, i32, i32) {
    %c1_i32 = arith.constant 1 : i32
    %0 = arith.addi %arg1, %c1_i32 : i32
    %c8_i32 = arith.constant 8 : i32
    %1 = arith.muli %0, %c8_i32 : i32
    %c0_i32 = arith.constant 0 : i32
    %c0_i32_0 = arith.constant 0 : i32
    %c0_i32_1 = arith.constant 0 : i32
    return %arg0, %1, %c0_i32, %c0_i32_0 : i32, i32, i32, i32
  }
  func.func @transform_2(%arg0: i32, %arg1: i32) -> (i32, i32, i32) {
    %c0_i32 = arith.constant 0 : i32
    %c0_i32_0 = arith.constant 0 : i32
    %c0_i32_1 = arith.constant 0 : i32
    %c0_i32_2 = arith.constant 0 : i32
    return %c0_i32, %c0_i32_0, %c0_i32_1 : i32, i32, i32
  }
  func.func @transform_3(%arg0: i32, %arg1: i32) -> (i32, i32) {
    %c0_i32 = arith.constant 0 : i32
    %c0_i32_0 = arith.constant 0 : i32
    %c0_i32_1 = arith.constant 0 : i32
    return %c0_i32, %c0_i32_0 : i32, i32
  }
  func.func @transform_4(%arg0: i32, %arg1: i32) -> (i32, i32, i32, i32) {
    %c0_i32 = arith.constant 0 : i32
    %c0_i32_0 = arith.constant 0 : i32
    %c0_i32_1 = arith.constant 0 : i32
    return %arg0, %arg1, %c0_i32, %c0_i32_0 : i32, i32, i32, i32
  }
}

</mosaic_0001>

<bundles_post_ra>
// kernel: tpu_custom_call.1
= control target key start
LH: loop header
LB: loop body
LE: loop exit
PB: predicated region body
PF: predicated region fallthrough
CT: control target
= control target key end

     0   :  { %9 = vsyncpa [#allocation4], 0  ;;  %s5786_s0 = inlined_call_operand.vmem [shape: bf16[2,18,24,8], index: 0, kind: input, shape index: {}]   ;;  %s5787_s1 = inlined_call_operand.vmem [shape: bf16[2,18,24,8], index: 1, kind: input, shape index: {}]   ;;  %s5788_s2 = inlined_call_operand.vmem [shape: bf16[3,8,384], index: 2, kind: input, shape index: {}]   ;;  %s5789_s3 = inlined_call_operand.vmem [shape: f32[1,128], index: 3, kind: input, shape index: {}]   ;;  %s5790_s4 = inlined_call_operand.hbm [shape: bf16[2,16,16,128], index: 4, kind: output, shape index: {}]  }
   0x1   :  { %11 = vsyncpa [#allocation4 + $0x1], 0  ;;  %s4780_s15 = smov 0   ;;  %s4782_s16 = smov 0  }
   0x2   :  { %s4784_s17 = smov 0   ;;  %s4786_s18 = smov 0  }
   0x3   :  { %s4788_s19 = smov 0   ;;  %s4790_s20 = smov 0  }
   0x4 LB: > { %s3929_s21 = sadd.s32 4294967295, %s4751_s20   ;;  %s3930_s22 = sadd.s32 4294967294, %s4751_s20   ;;  %s4751_s20 = sphi %s4790_s20, %s17_s20   ;;  %s4747_s19 = sphi %s4788_s19, %s5803_s19   ;;  %s4743_s18 = sphi %s4786_s18, %s5802_s18   ;;  %s4739_s17 = sphi %s4784_s17, %s5801_s17   ;;  %s4735_s16 = sphi %s4782_s16, %s5800_s16   ;;  %s4731_s15 = sphi %s4780_s15, %s5799_s15  }
   0x5   : > { %s29_s23 = sadd.s32 1, %s4747_s19  ;;  %s140_s24 = sadd.s32 1, %s4739_s17 }
   0x6   : > { %p31_p0 = scmp.ge.s32.totalorder %s29_s23, 2  ;;  %p150_p1 = scmp.ne.s32.totalorder %s4739_s17, %s4735_s16 }
   0x7   : > { %p151_p2 = scmp.eq.s32.totalorder %s3929_s21, 1  ;;  %p156_p3 = scmp.ne.s32.totalorder %s4735_s16, %s4731_s15 }
   0x8   : > { %s5805_s23 = smov (%p31_p0, %s29_s23), 0  ;;  %p157_p5 = scmp.eq.s32.totalorder %s3930_s22, 1 }
   0x9   : > { %p4820_p4 = por %p151_p2, %p150_p1  ;;  %s135_s26 = ssub.s32 %s4747_s19, %s5805_s23 }
   0xa   : > { %p3933_p6 = scmp.ge.s32.totalorder %s4751_s20, 1  ;;  %p138_p7 = scmp.eq.s32.totalorder %s135_s26, 0 }
   0xb   : > { %p4827_p8 = por %p157_p5, %p156_p3  ;;  %p223_p9 = scmp.lt.s32.totalorder %s4751_s20, 3 }
   0xc   : > { %s4833_s28 = scalar_select %p138_p7, %s4739_s17, %s140_s24  }
   0xd   : > { %p224_p10 = pnand %p3933_p6, %p223_p9 }
   0xf   : > { %227 = sbr.rel (%p224_p10) target bundleno = 1037 (0x40d), region = 36 }
  0x14   : > { %v363_v0 = vld [vmem:[%s5788_s2] sm:$0xff]  ;;  %p277_p11 = scmp.lt.s32.totalorder %s4743_s18, 1  ;;  %v4013_v1 = vld [vmem:[%s5788_s2 + $0xc] sm:$0xff]  ;;  %v364_v6 = vld [vmem:[%s5788_s2 + $0x8] sm:$0xf]  ;;  %vm566_vm0 = vcmask 1043456  }
  0x15   : > { %v487_v2 = vunpack.c.l.b16 %v363_v0  ;;  %v1528_v3 = vunpack.c.l.b16 %v4013_v1  ;;  %v488_v4 = vunpack.c.h.b16 %v363_v0  ;;  %v1529_v5 = vunpack.c.h.b16 %v4013_v1  ;;  %v4087_v38 = vld [vmem:[%s5788_s2 + $0x18] sm:$0xff]  ;;  %v4014_v39 = vld [vmem:[%s5788_s2 + $0x14] sm:$0xf]  ;;  %v4088_v40 = vld [vmem:[%s5788_s2 + $0x20] sm:$0xf]  ;;  %s4174_s21 = sshll.u32 %s4743_s18, 7 }
  0x16   : > { %s4846_s9 = scalar_select %p277_p11, %s4743_s18, 1  ;;  %v489_v7 = vunpack.c.l.b16 %v364_v6  ;;  %vm493_vm1 = vcmask 64512   ;;  %v2609_v41 = vunpack.c.h.b16 %v4087_v38  ;;  %v1530_v42 = vunpack.c.l.b16 %v4014_v39 }
  0x17   : > { %v490_v8 = vpack.c.b16 %v487_v2, %v487_v2  ;;  %v1531_v9 = vpack.c.b16 %v1528_v3, %v1528_v3  ;;  %v491_v10 = vpack.c.b16 %v488_v4, %v488_v4  ;;  %v1532_v11 = vpack.c.b16 %v1529_v5, %v1529_v5  ;;  %s3822_s26 = scalar_lea.hbm %s5790_s4, %s4174_s21 }
  0x18   : > { %s4565_s10 = smul.u32 216, %s4846_s9  ;;  %v492_v12 = vpack.c.b16 %v489_v7, %v489_v7  ;;  %v2610_v43 = vunpack.c.l.b16 %v4088_v40  ;;  %v2608_v44 = vunpack.c.l.b16 %v4087_v38  ;;  %v2612_v45 = vpack.c.b16 %v2609_v41, %v2609_v41  ;;  %s4693_s9 = scalar_lea.hbm %s5790_s4, 256 }
  0x19   : > { %v568_v13 = vsel %vm566_vm0, %v490_v8, 0  ;;  %v1607_v14 = vsel %vm566_vm0, %v1531_v9, 0  ;;  %v571_v15 = vsel %vm566_vm0, %v491_v10, 0  ;;  %v1610_v20 = vsel %vm566_vm0, %v1532_v11, 0 }
  0x1a   : > { %4558 = vmatpush.bf16.msra.mxu1 %v568_v13  ;;  %4559 = vmatpush.bf16.msra.mxu2 %v568_v13  ;;  %s4857_s13 = scalar_lea.vmem %s5786_s0, %s4565_s10  ;;  %v574_v21 = vsel %vm566_vm0, %v492_v12, 0  ;;  %v1533_v46 = vpack.c.b16 %v1530_v42, %v1530_v42  ;;  %v2613_v47 = vpack.c.b16 %v2610_v43, %v2610_v43  ;;  %v2611_v48 = vpack.c.b16 %v2608_v44, %v2608_v44  ;;  %s4171_s30 = sadd.s32 192, %s4565_s10 }
  0x1b   : > { %4560 = vmatpush.bf16.msra.mxu3 %v568_v13  ;;  %583 = vmatpush.bf16.msra.mxu0 %v568_v13  ;;  %v4860_v16 = vld [vmem:[%s4857_s13 + $0x30] sm:$0xff]   ;;  %v4863_v17 = vld [vmem:[%s4857_s13 + $0x60] sm:$0xff]   ;;  %v4882_v22 = vld [vmem:[%s4857_s13 + $0x38] sm:$0xff]   ;;  %v2627_v49 = vsel %vm566_vm0, %v2612_v45, 0  ;;  %vm1059_vm2 = vcmask 1046528   ;;  %vm1316_vm3 = vcmask 1045504   ;;  %s5307_s7 = scalar_lea.vmem %s5787_s1, %s4171_s30 }
  0x1c   : > { %v4866_v18 = vld [vmem:[%s4857_s13 + $0x90] sm:$0xff]   ;;  %v4869_v19 = vld [vmem:[%s4857_s13] sm:$0xff]  ;;  %v4885_v23 = vld [vmem:[%s4857_s13 + $0x68] sm:$0xff]   ;;  %v1613_v50 = vsel %vm566_vm0, %v1533_v46, 0  ;;  %v2630_v51 = vsel %vm566_vm0, %v2613_v47, 0  ;;  %v2624_v52 = vsel %vm566_vm0, %v2611_v48, 0 }
  0x1d   : > { %3947 = vmatmul.msk.bf16.vlgmr.msra.gmra.mxu1 %vm493_vm1, %v4860_v16  ;;  %3953 = vmatmul.msk.bf16.vlgmr.msra.gmra.mxu2 %vm493_vm1, %v4863_v17  ;;  %v4888_v24 = vld [vmem:[%s4857_s13 + $0x98] sm:$0xff]   ;;  %v4891_v25 = vld [vmem:[%s4857_s13 + $0x8] sm:$0xff]   ;;  %v4902_v26 = vld [vmem:[%s4857_s13 + $0x40] sm:$0xff]   ;;  %s268_s10 = sand.u32 1, %s4735_s16   ;;  %s3825_s30 = sshll.u32 %s3822_s26, 4  ;;  %s3826_s30 = int_to_ptr.hbm [resolvable:$true] %s3825_s30 }
  0x1e   : > { %696 = vmatpush.bf16.msrb.mxu1 %v571_v15  ;;  %3959 = vmatmul.msk.bf16.vlgmr.msra.gmra.mxu3 %vm493_vm1, %v4866_v18  ;;  %v4905_v27 = vld [vmem:[%s4857_s13 + $0x70] sm:$0xff]   ;;  %v4908_v28 = vld [vmem:[%s4857_s13 + $0xa0] sm:$0xff]   ;;  %v4919_v30 = vld [vmem:[%s4857_s13 + $0x48] sm:$0xff]   ;;  %s3934_s11 = sshll.u32 %s268_s10, 7  ;;  %s3808_s18 = scalar_lea.sflag [#allocation4], %s268_s10 }
  0x1f   : > { %1622 = vmatpush.bf16.msrb.mxu3 %v1607_v14  ;;  %3941 = vmatmul.msk.bf16.vlgmr.msra.gmra.mxu0 %vm493_vm1, %v4869_v19  ;;  %v4356_v29 = vld [vmem:[%s4857_s13 + $0x10] sm:$0xff]   ;;  %v4922_v31 = vld [vmem:[%s4857_s13 + $0x78] sm:$0xff]   ;;  %v4925_v32 = vld [vmem:[%s4857_s13 + $0xa8] sm:$0xff]   ;;  %s5498_s12 = scalar_lea.vmem [#allocation3], %s3934_s11  ;;  %s4687_s5 = sshra.s32 %s3826_s30, 4  ;;  %s4688_s5 = int_to_ptr.hbm [resolvable:$true] %s4687_s5 }
  0x20   : > { %1735 = vmatpush.bf16.msrb.mxu0 %v1610_v20  ;;  %825 = vmatpush.bf16.msrb.mxu2 %v574_v21  ;;  %v4928_v33 = vld [vmem:[%s4857_s13 + $0x18] sm:$0xff]   ;;  %v4939_v34 = vld [vmem:[%s4857_s13 + $0x50] sm:$0xff]   ;;  %v4942_v35 = vld [vmem:[%s4857_s13 + $0x80] sm:$0xff]   ;;  %s3823_s29 = sshll.u32 %s5498_s12, 4  ;;  %s4689_s6 = scalar_lea.hbm %s4688_s5, 128  ;;  %s3824_s29 = int_to_ptr.vmem [resolvable:$true] %s3823_s29 }
  0x21   : > { %v4376_v36 = vld [vmem:[%s4857_s13 + $0xb0] sm:$0xff]   ;;  %v4946_v37 = vld [vmem:[%s4857_s13 + $0x20] sm:$0xff]   ;;  %v4969_v53 = vld [vmem:[%s4857_s13 + $0x58] sm:$0xff]   ;;  %p4690_p12 = scmp.ne.s32.totalorder %s4688_s5, %s4689_s6  ;;  %p4694_p1 = scmp.lt.s32.totalorder %s4688_s5, %s5790_s4 }
  0x22   : > { %1864 = vmatpush.bf16.msra.mxu1 %v1613_v50  ;;  %v4972_v54 = vld [vmem:[%s4857_s13 + $0x88] sm:$0xff]   ;;  %v4377_v55 = vld [vmem:[%s4857_s13 + $0xb8] sm:$0xff]   ;;  %p4695_p2 = scmp.lt.s32.totalorder %s4693_s9, %s4689_s6 }
  0x23   : > { %2752 = vmatpush.bf16.msra.mxu3 %v2627_v49  ;;  %v4359_v56 = vld [vmem:[%s4857_s13 + $0x28] sm:$0xff]   ;;  %v4508_v58 = vld [vmem:[%s4857_s13 + $0x14] sm:$0xff]   ;;  %v4510_v60 = vld [vmem:[%s4857_s13 + $0x1c] sm:$0xff]   ;;  %p4691_p13 = pnand %p4690_p12, %p4820_p4 }
  0x24   : > { %2881 = vmatpush.bf16.msra.mxu0 %v2630_v51  ;;  %2639 = vmatpush.bf16.msra.mxu2 %v2624_v52  ;;  %v4506_v57 = vld [vmem:[%s4857_s13 + $0xc] sm:$0xff]   ;;  %v4512_v5 = vld [vmem:[%s4857_s13 + $0x24] sm:$0xff]   ;;  %v4516_v38 = vld [vmem:[%s4857_s13 + $0x34] sm:$0xff]   ;;  %p4696_p3 = por %p4695_p2, %p4694_p1 }
  0x25   : > { %v4514_v14 = vld [vmem:[%s4857_s13 + $0x2c] sm:$0xff]   ;;  %v4518_v46 = vld [vmem:[%s4857_s13 + $0x3c] sm:$0xff]   ;;  %p4692_p0 = pneg %p4691_p13 }
  0x27   : > { %p4697_p5 = pnand %p4696_p3, %p4692_p0 }
  0x2d   : > { %3948 = vmatmul.msk.bf16.gmra.mxu1 %vm493_vm1, %v4882_v22  ;;  %3954 = vmatmul.msk.bf16.gmra.mxu2 %vm493_vm1, %v4885_v23 }
  0x2e   : > { %3960 = vmatmul.msk.bf16.gmra.mxu3 %vm493_vm1, %v4888_v24 }
  0x2f   : > { %3942 = vmatmul.msk.bf16.gmra.mxu0 %vm493_vm1, %v4891_v25 }
  0x3d   : > { %3949 = vmatmul.msk.bf16.gmra.mxu1 %vm493_vm1, %v4902_v26  ;;  %3955 = vmatmul.msk.bf16.gmra.mxu2 %vm493_vm1, %v4905_v27 }
  0x3e   : > { %3961 = vmatmul.msk.bf16.gmra.mxu3 %vm493_vm1, %v4908_v28 }
  0x3f   : > { %3943 = vmatmul.msk.bf16.gmra.mxu0 %vm493_vm1, %v4356_v29 }
  0x4d   : > { %3950 = vmatmul.msk.bf16.gmra.mxu1 %vm493_vm1, %v4919_v30  ;;  %3956 = vmatmul.msk.bf16.gmra.mxu2 %vm493_vm1, %v4922_v31 }
  0x4e   : > { %3962 = vmatmul.msk.bf16.gmra.mxu3 %vm493_vm1, %v4925_v32 }
  0x4f   : > { %3944 = vmatmul.msk.bf16.gmra.mxu0 %vm493_vm1, %v4928_v33 }
  0x5d   : > { %3951 = vmatmul.msk.bf16.gmra.mxu1 %vm493_vm1, %v4939_v34  ;;  %3957 = vmatmul.msk.bf16.gmra.mxu2 %vm493_vm1, %v4942_v35 }
  0x5e   : > { %3963 = vmatmul.msk.bf16.gmra.mxu3 %vm493_vm1, %v4376_v36 }
  0x5f   : > { %3945 = vmatmul.msk.bf16.gmra.mxu0 %vm493_vm1, %v4946_v37 }
  0x6d   : > { %3952 = vmatmul.msk.bf16.gmra.mxu1 %vm493_vm1, %v4969_v53  ;;  %3958 = vmatmul.msk.bf16.gmra.mxu2 %vm493_vm1, %v4972_v54 }
  0x6e   : > { %3964 = vmatmul.msk.bf16.gmra.mxu3 %vm493_vm1, %v4377_v55 }
  0x6f   : > { %3946 = vmatmul.msk.bf16.gmra.mxu0 %vm493_vm1, %v4359_v56 }
  0x7d   : > { %3965 = vmatmul.msk.bf16.vlgmr.msrb.gmra.mxu1 %vm493_vm1, %v4869_v19  ;;  %3989 = vmatmul.msk.bf16.vlgmr.msrb.gmra.mxu2 %vm493_vm1, %v4869_v19 }
  0x7e   : > { %4015 = vmatmul.msk.bf16.vlgmr.msrb.gmra.mxu3 %vm493_vm1, %v4506_v57 }
  0x7f   : > { %4039 = vmatmul.msk.bf16.vlgmr.msrb.gmra.mxu0 %vm493_vm1, %v4506_v57  ;;  %v4520_v57 = vld [vmem:[%s4857_s13 + $0x44] sm:$0xff]  }
  0x8d   : > { %3966 = vmatmul.msk.bf16.gmra.mxu1 %vm493_vm1, %v4891_v25  ;;  %3990 = vmatmul.msk.bf16.gmra.mxu2 %vm493_vm1, %v4891_v25 }
  0x8e   : > { %4016 = vmatmul.msk.bf16.gmra.mxu3 %vm493_vm1, %v4508_v58 }
  0x8f   : > { %4040 = vmatmul.msk.bf16.gmra.mxu0 %vm493_vm1, %v4508_v58 }
  0x9a   : > { %v4996_v59 = vpop.f32.mrf.mxu1 }
  0x9c   : > { %v4999_v61 = vpop.f32.mrf.mxu0 }
  0x9d   : > { %3967 = vmatmul.msk.bf16.gmra.mxu1 %vm493_vm1, %v4356_v29  ;;  %3991 = vmatmul.msk.bf16.gmra.mxu2 %vm493_vm1, %v4356_v29 }
  0x9e   : > { %4017 = vmatmul.msk.bf16.gmra.mxu3 %vm493_vm1, %v4510_v60 }
  0x9f   : > { %4041 = vmatmul.msk.bf16.gmra.mxu0 %vm493_vm1, %v4510_v60 }
  0xa0   : > { %v5005_v62 = vpop.f32.mrf.mxu2 }
  0xa1   : > { %v5007_v63 = vpop.f32.mrf.mxu3 }
  0xa2   : > { %v5009_v0 = vpop.f32.mrf.mxu1 }
  0xa4   : > { %v5011_v1 = vpop.f32.mrf.mxu0 }
  0xa8   : > { %v5013_v2 = vpop.f32.mrf.mxu2 }
  0xa9   : > { %v5015_v3 = vpop.f32.mrf.mxu3 }
  0xaa   : > { %v616_v4 = vpop.f32.mrf.mxu1 }
  0xac   : > { %v590_v6 = vpop.f32.mrf.mxu0 }
  0xad   : > { %3968 = vmatmul.msk.bf16.gmra.mxu1 %vm493_vm1, %v4928_v33  ;;  %3992 = vmatmul.msk.bf16.gmra.mxu2 %vm493_vm1, %v4928_v33 }
  0xae   : > { %4018 = vmatmul.msk.bf16.gmra.mxu3 %vm493_vm1, %v4512_v5 }
  0xaf   : > { %4042 = vmatmul.msk.bf16.gmra.mxu0 %vm493_vm1, %v4512_v5 }
  0xb0   : > { %v642_v7 = vpop.f32.mrf.mxu2 }
  0xb1   : > { %v668_v8 = vpop.f32.mrf.mxu3 }
  0xb2   : > { %v5024_v9 = vpop.f32.mrf.mxu1 }
  0xb4   : > { %v5026_v10 = vpop.f32.mrf.mxu0 }
  0xb8   : > { %v5028_v11 = vpop.f32.mrf.mxu2 }
  0xb9   : > { %v5030_v12 = vpop.f32.mrf.mxu3 }
  0xba   : > { %v5032_v13 = vpop.f32.mrf.mxu1 }
  0xbc   : > { %v5035_v15 = vpop.f32.mrf.mxu0 }
  0xbd   : > { %3969 = vmatmul.msk.bf16.gmra.mxu1 %vm493_vm1, %v4946_v37  ;;  %3993 = vmatmul.msk.bf16.gmra.mxu2 %vm493_vm1, %v4946_v37 }
  0xbe   : > { %4019 = vmatmul.msk.bf16.gmra.mxu3 %vm493_vm1, %v4514_v14 }
  0xbf   : > { %4043 = vmatmul.msk.bf16.gmra.mxu0 %vm493_vm1, %v4514_v14  ;;  %v4522_v14 = vld [vmem:[%s4857_s13 + $0x4c] sm:$0xff]  }
  0xc0   : > { %v5043_v19 = vpop.f32.mrf.mxu2 }
  0xc1   : > { %v5045_v20 = vpop.f32.mrf.mxu3 }
  0xc2   : > { %v622_v21 = vpop.f32.mrf.mxu1 }
  0xc4   : > { %v596_v25 = vpop.f32.mrf.mxu0 }
  0xc8   : > { %v648_v29 = vpop.f32.mrf.mxu2 }
  0xc9   : > { %v674_v33 = vpop.f32.mrf.mxu3 }
  0xca   : > { %v5047_v36 = vpop.f32.mrf.mxu1 }
  0xcc   : > { %v5050_v39 = vpop.f32.mrf.mxu0 }
  0xcd   : > { %3970 = vmatmul.msk.bf16.gmra.mxu1 %vm493_vm1, %v4359_v56  ;;  %3994 = vmatmul.msk.bf16.gmra.mxu2 %vm493_vm1, %v4359_v56 }
  0xce   : > { %4020 = vmatmul.msk.bf16.gmra.mxu3 %vm493_vm1, %v4516_v38 }
  0xcf   : > { %4044 = vmatmul.msk.bf16.gmra.mxu0 %vm493_vm1, %v4516_v38 }
  0xd0   : > { %v5056_v37 = vpop.f32.mrf.mxu2 }
  0xd1   : > { %v5058_v40 = vpop.f32.mrf.mxu3 }
  0xd2   : > { %v5060_v41 = vpop.f32.mrf.mxu1 }
  0xd4   : > { %v5062_v42 = vpop.f32.mrf.mxu0 }
  0xd8   : > { %v5064_v43 = vpop.f32.mrf.mxu2 }
  0xd9   : > { %v5066_v44 = vpop.f32.mrf.mxu3 }
  0xda   : > { %v629_v45 = vpop.f32.mrf.mxu1 }
  0xdc   : > { %v603_v47 = vpop.f32.mrf.mxu0 }
  0xdd   : > { %3971 = vmatmul.msk.bf16.gmra.mxu1 %vm493_vm1, %v4860_v16  ;;  %3995 = vmatmul.msk.bf16.gmra.mxu2 %vm493_vm1, %v4860_v16 }
  0xde   : > { %4021 = vmatmul.msk.bf16.gmra.mxu3 %vm493_vm1, %v4518_v46 }
  0xdf   : > { %4045 = vmatmul.msk.bf16.gmra.mxu0 %vm493_vm1, %v4518_v46 }
  0xe0   : > { %v655_v48 = vpop.f32.mrf.mxu2 }
  0xe1   : > { %v681_v49 = vpop.f32.mrf.mxu3 }
  0xe2   : > { %v5075_v50 = vpop.f32.mrf.mxu1 }
  0xe4   : > { %v5077_v51 = vpop.f32.mrf.mxu0 }
  0xe8   : > { %v5079_v52 = vpop.f32.mrf.mxu2 }
  0xe9   : > { %v5081_v55 = vpop.f32.mrf.mxu3 }
  0xea   : > { %5793 = vst [vmem:[#allocation6_spill] sm:$0xff] %v5081_v55  ;;  %v5083_v56 = vpop.f32.mrf.mxu1 }
  0xec   : > { %v5086_v58 = vpop.f32.mrf.mxu0 }
  0xed   : > { %3972 = vmatmul.msk.bf16.gmra.mxu1 %vm493_vm1, %v4882_v22  ;;  %3996 = vmatmul.msk.bf16.gmra.mxu2 %vm493_vm1, %v4882_v22 }
  0xee   : > { %4022 = vmatmul.msk.bf16.gmra.mxu3 %vm493_vm1, %v4520_v57 }
  0xef   : > { %4046 = vmatmul.msk.bf16.gmra.mxu0 %vm493_vm1, %v4520_v57 }
  0xf0   : > { %v5094_v16 = vpop.f32.mrf.mxu2 }
  0xf1   : > { %v5096_v60 = vpop.f32.mrf.mxu3 }
  0xf2   : > { %5794 = vst [vmem:[#allocation7_spill] sm:$0xff] %v5096_v60  ;;  %v635_v4 = vpop.f32.mrf.mxu1 }
  0xf4   : > { %v609_v5 = vpop.f32.mrf.mxu0 }
  0xf8   : > { %v661_v6 = vpop.f32.mrf.mxu2 }
  0xf9   : > { %v687_v7 = vpop.f32.mrf.mxu3 }
  0xfa   : > { %v698_v8 = vpop.f32.mrf.mxu1 }
  0xfb   : > { %v1060_v38 = vrot.slane %v698_v8, 1 }
  0xfc   : > { %v1737_v21 = vpop.f32.mrf.mxu0 }
  0xfd   : > { %3973 = vmatmul.msk.bf16.gmra.mxu1 %vm493_vm1, %v4902_v26  ;;  %3997 = vmatmul.msk.bf16.gmra.mxu2 %vm493_vm1, %v4902_v26  ;;  %v2162_v29 = vrot.slane %v1737_v21, 1 }
  0xfe   : > { %4023 = vmatmul.msk.bf16.gmra.mxu3 %vm493_vm1, %v4522_v14 }
  0xff   : > { %4047 = vmatmul.msk.bf16.gmra.mxu0 %vm493_vm1, %v4522_v14  ;;  %v4524_v14 = vld [vmem:[%s4857_s13 + $0x54] sm:$0xff]  }
 0x100   : > { %v827_v22 = vpop.f32.mrf.mxu2 }
 0x101   : > { %v1624_v25 = vpop.f32.mrf.mxu3  ;;  %v1317_v57 = vrot.slane %v827_v22, 2 }
 0x102   : > { %v700_v33 = vpop.f32.mrf.mxu1 }
 0x103   : > { %v1061_v45 = vrot.slane %v700_v33, 1 }
 0x104   : > { %v1739_v46 = vpop.f32.mrf.mxu0 }
 0x105   : > { %v2163_v47 = vrot.slane %v1739_v46, 1  ;;  %v1062_v48 = vsel %vm1059_vm2, %v1060_v38, %v1061_v45 }
 0x106   : > { %v1172_v6 = vadd.f32 %v1062_v48, %v4999_v61 }
 0x107   : > { %v2164_v49 = vsel %vm1059_vm2, %v2162_v29, %v2163_v47 }
 0x108   : > { %v829_v26 = vpop.f32.mrf.mxu2 }
 0x109   : > { %v1318_v4 = vrot.slane %v829_v26, 2  ;;  %v1626_v5 = vpop.f32.mrf.mxu3 }
 0x10a   : > { %v703_v7 = vpop.f32.mrf.mxu1 }
 0x10b   : > { %v1319_v21 = vsel %vm1316_vm3, %v1317_v57, %v1318_v4  ;;  %v1063_v60 = vrot.slane %v703_v7, 1 }
 0x10c   : > { %v1742_v8 = vpop.f32.mrf.mxu0  ;;  %v1429_v33 = vadd.f32 %v1319_v21, %v1172_v6 }
 0x10d   : > { %v2165_v55 = vrot.slane %v1742_v8, 1  ;;  %v1064_v46 = vsel %vm1059_vm2, %v1061_v45, %v1063_v60  ;;  %3974 = vmatmul.msk.bf16.gmra.mxu1 %vm493_vm1, %v4919_v30  ;;  %3998 = vmatmul.msk.bf16.gmra.mxu2 %vm493_vm1, %v4919_v30  ;;  %v4526_v8 = vld [vmem:[%s4857_s13 + $0x5c] sm:$0xff]  }
 0x10e   : > { %v2018_v22 = vadd.f32 %v1624_v25, %v1429_v33  ;;  %4024 = vmatmul.msk.bf16.gmra.mxu3 %vm493_vm1, %v4524_v14  ;;  %v1173_v60 = vadd.f32 %v1064_v46, %v5011_v1 }
 0x10f   : > { %v2166_v29 = vsel %vm1059_vm2, %v2163_v47, %v2165_v55  ;;  %4048 = vmatmul.msk.bf16.gmra.mxu0 %vm493_vm1, %v4524_v14 }
 0x110   : > { %v832_v61 = vpop.f32.mrf.mxu2  ;;  %v5118_v38 = vadd.f32 %v2164_v49, %v2018_v22 }
 0x111   : > { %v1320_v48 = vrot.slane %v832_v61, 2  ;;  %v1629_v57 = vpop.f32.mrf.mxu3 }
 0x112   : > { %v705_v45 = vpop.f32.mrf.mxu1 }
 0x113   : > { %v1321_v26 = vsel %vm1316_vm3, %v1318_v4, %v1320_v48  ;;  %v1065_v14 = vrot.slane %v705_v45, 1 }
 0x114   : > { %v1744_v6 = vpop.f32.mrf.mxu0  ;;  %v1430_v30 = vadd.f32 %v1321_v26, %v1173_v60 }
 0x115   : > { %v2167_v22 = vrot.slane %v1744_v6, 1 }
 0x116   : > { %v2019_v25 = vadd.f32 %v1626_v5, %v1430_v30 }
 0x118   : > { %v834_v7 = vpop.f32.mrf.mxu2  ;;  %v5122_v55 = vadd.f32 %v2166_v29, %v2019_v25 }
 0x119   : > { %v1630_v47 = vpop.f32.mrf.mxu3  ;;  %v1322_v5 = vrot.slane %v834_v7, 2 }
 0x11a   : > { %5795 = vst [vmem:[#allocation8_spill] sm:$0xff] %v5122_v55  ;;  %v708_v21 = vpop.f32.mrf.mxu1 }
 0x11b   : > { %v1066_v33 = vrot.slane %v708_v21, 1 }
 0x11c   : > { %v1747_v49 = vpop.f32.mrf.mxu0 }
 0x11d   : > { %v2168_v61 = vrot.slane %v1747_v49, 1  ;;  %v1067_v57 = vsel %vm1059_vm2, %v1065_v14, %v1066_v33  ;;  %3975 = vmatmul.msk.bf16.gmra.mxu1 %vm493_vm1, %v4939_v34  ;;  %3999 = vmatmul.msk.bf16.gmra.mxu2 %vm493_vm1, %v4939_v34 }
 0x11e   : > { %4025 = vmatmul.msk.bf16.gmra.mxu3 %vm493_vm1, %v4526_v8  ;;  %v1174_v48 = vadd.f32 %v1067_v57, %v5026_v10 }
 0x11f   : > { %v2169_v1 = vsel %vm1059_vm2, %v2167_v22, %v2168_v61  ;;  %4049 = vmatmul.msk.bf16.gmra.mxu0 %vm493_vm1, %v4526_v8 }
 0x120   : > { %v837_v4 = vpop.f32.mrf.mxu2 }
 0x121   : > { %v1323_v46 = vrot.slane %v837_v4, 2  ;;  %v1633_v29 = vpop.f32.mrf.mxu3  ;;  %v4528_v4 = vld [vmem:[%s4857_s13 + $0x64] sm:$0xff]  }
 0x122   : > { %v710_v60 = vpop.f32.mrf.mxu1 }
 0x123   : > { %v1324_v45 = vsel %vm1316_vm3, %v1322_v5, %v1323_v46  ;;  %v1068_v26 = vrot.slane %v710_v60, 1 }
 0x124   : > { %v1749_v6 = vpop.f32.mrf.mxu0  ;;  %v1431_v30 = vadd.f32 %v1324_v45, %v1174_v48 }
 0x125   : > { %v2170_v34 = vrot.slane %v1749_v6, 1  ;;  %v1069_v25 = vsel %vm1059_vm2, %v1066_v33, %v1068_v26 }
 0x126   : > { %v2020_v21 = vadd.f32 %v1630_v47, %v1431_v30  ;;  %v1175_v10 = vadd.f32 %v1069_v25, %v5035_v15 }
 0x127   : > { %v2171_v14 = vsel %vm1059_vm2, %v2168_v61, %v2170_v34 }
 0x128   : > { %v839_v8 = vpop.f32.mrf.mxu2  ;;  %v5137_v49 = vadd.f32 %v2169_v1, %v2020_v21 }
 0x129   : > { %v1325_v7 = vrot.slane %v839_v8, 2  ;;  %v1635_v22 = vpop.f32.mrf.mxu3  ;;  %v4530_v8 = vld [vmem:[%s4857_s13 + $0x6c] sm:$0xff]  }
 0x12a   : > { %v713_v57 = vpop.f32.mrf.mxu1 }
 0x12b   : > { %v1326_v5 = vsel %vm1316_vm3, %v1323_v46, %v1325_v7  ;;  %v1070_v48 = vrot.slane %v713_v57, 1 }
 0x12c   : > { %v1752_v60 = vpop.f32.mrf.mxu0  ;;  %v1432_v55 = vadd.f32 %v1326_v5, %v1175_v10 }
 0x12d   : > { %3976 = vmatmul.msk.bf16.gmra.mxu1 %vm493_vm1, %v4969_v53  ;;  %4000 = vmatmul.msk.bf16.gmra.mxu2 %vm493_vm1, %v4969_v53  ;;  %v2172_v1 = vrot.slane %v1752_v60, 1 }
 0x12e   : > { %v2021_v47 = vadd.f32 %v1633_v29, %v1432_v55  ;;  %4026 = vmatmul.msk.bf16.gmra.mxu3 %vm493_vm1, %v4528_v4 }
 0x12f   : > { %4050 = vmatmul.msk.bf16.gmra.mxu0 %vm493_vm1, %v4528_v4 }
 0x130   : > { %v842_v33 = vpop.f32.mrf.mxu2  ;;  %v5148_v61 = vadd.f32 %v2171_v14, %v2021_v47 }
 0x131   : > { %v1637_v15 = vpop.f32.mrf.mxu3  ;;  %v1327_v55 = vrot.slane %v842_v33, 2 }
 0x132   : > { %v715_v46 = vpop.f32.mrf.mxu1 }
 0x133   : > { %v1071_v45 = vrot.slane %v715_v46, 1 }
 0x134   : > { %v1754_v26 = vpop.f32.mrf.mxu0 }
 0x135   : > { %v2173_v6 = vrot.slane %v1754_v26, 1  ;;  %v1072_v30 = vsel %vm1059_vm2, %v1070_v48, %v1071_v45 }
 0x136   : > { %v1176_v21 = vadd.f32 %v1072_v30, %v5050_v39 }
 0x137   : > { %v2174_v53 = vsel %vm1059_vm2, %v2172_v1, %v2173_v6 }
 0x138   : > { %v844_v29 = vpop.f32.mrf.mxu2 }
 0x139   : > { %v1328_v34 = vrot.slane %v844_v29, 2  ;;  %v1639_v25 = vpop.f32.mrf.mxu3 }
 0x13a   : > { %v718_v14 = vpop.f32.mrf.mxu1 }
 0x13b   : > { %v1329_v7 = vsel %vm1316_vm3, %v1327_v55, %v1328_v34  ;;  %v1073_v22 = vrot.slane %v718_v14, 1  ;;  %v4532_v14 = vld [vmem:[%s4857_s13 + $0x74] sm:$0xff]  }
 0x13c   : > { %v1757_v10 = vpop.f32.mrf.mxu0  ;;  %v1433_v57 = vadd.f32 %v1329_v7, %v1176_v21 }
 0x13d   : > { %v2175_v4 = vrot.slane %v1757_v10, 1  ;;  %v1074_v5 = vsel %vm1059_vm2, %v1071_v45, %v1073_v22  ;;  %3977 = vmatmul.msk.bf16.gmra.mxu1 %vm493_vm1, %v4863_v17  ;;  %4001 = vmatmul.msk.bf16.gmra.mxu2 %vm493_vm1, %v4863_v17 }
 0x13e   : > { %v2022_v60 = vadd.f32 %v1637_v15, %v1433_v57  ;;  %4027 = vmatmul.msk.bf16.gmra.mxu3 %vm493_vm1, %v4530_v8  ;;  %v1177_v48 = vadd.f32 %v1074_v5, %v5062_v42 }
 0x13f   : > { %v2176_v47 = vsel %vm1059_vm2, %v2173_v6, %v2175_v4  ;;  %4051 = vmatmul.msk.bf16.gmra.mxu0 %vm493_vm1, %v4530_v8 }
 0x140   : > { %v847_v39 = vpop.f32.mrf.mxu2  ;;  %v5163_v33 = vadd.f32 %v2174_v53, %v2022_v60 }
 0x141   : > { %v1330_v1 = vrot.slane %v847_v39, 2  ;;  %v1642_v46 = vpop.f32.mrf.mxu3 }
 0x142   : > { %v720_v45 = vpop.f32.mrf.mxu1 }
 0x143   : > { %v1331_v26 = vsel %vm1316_vm3, %v1328_v34, %v1330_v1  ;;  %v1075_v8 = vrot.slane %v720_v45, 1 }
 0x144   : > { %v1759_v30 = vpop.f32.mrf.mxu0  ;;  %v1434_v17 = vadd.f32 %v1331_v26, %v1177_v48 }
 0x145   : > { %v2177_v22 = vrot.slane %v1759_v30, 1 }
 0x146   : > { %v2023_v15 = vadd.f32 %v1639_v25, %v1434_v17 }
 0x148   : > { %v849_v55 = vpop.f32.mrf.mxu2  ;;  %v5167_v6 = vadd.f32 %v2176_v47, %v2023_v15 }
 0x149   : > { %v1643_v29 = vpop.f32.mrf.mxu3  ;;  %v1332_v25 = vrot.slane %v849_v55, 2 }
 0x14a   : > { %v723_v21 = vpop.f32.mrf.mxu1 }
 0x14b   : > { %v1076_v7 = vrot.slane %v723_v21, 1 }
 0x14c   : > { %v1762_v53 = vpop.f32.mrf.mxu0 }
 0x14d   : > { %v2178_v10 = vrot.slane %v1762_v53, 1  ;;  %v1077_v57 = vsel %vm1059_vm2, %v1075_v8, %v1076_v7  ;;  %3978 = vmatmul.msk.bf16.gmra.mxu1 %vm493_vm1, %v4885_v23  ;;  %4002 = vmatmul.msk.bf16.gmra.mxu2 %vm493_vm1, %v4885_v23  ;;  %v4534_v8 = vld [vmem:[%s4857_s13 + $0x7c] sm:$0xff]  }
 0x14e   : > { %4028 = vmatmul.msk.bf16.gmra.mxu3 %vm493_vm1, %v4532_v14  ;;  %v1178_v60 = vadd.f32 %v1077_v57, %v5077_v51 }
 0x14f   : > { %v2179_v42 = vsel %vm1059_vm2, %v2177_v22, %v2178_v10  ;;  %4052 = vmatmul.msk.bf16.gmra.mxu0 %vm493_vm1, %v4532_v14 }
 0x150   : > { %v852_v34 = vpop.f32.mrf.mxu2 }
 0x151   : > { %v1333_v4 = vrot.slane %v852_v34, 2  ;;  %v1646_v5 = vpop.f32.mrf.mxu3 }
 0x152   : > { %v725_v47 = vpop.f32.mrf.mxu1 }
 0x153   : > { %v1334_v39 = vsel %vm1316_vm3, %v1332_v25, %v1333_v4  ;;  %v1078_v1 = vrot.slane %v725_v47, 1 }
 0x154   : > { %v1764_v46 = vpop.f32.mrf.mxu0  ;;  %v1435_v48 = vadd.f32 %v1334_v39, %v1178_v60 }
 0x155   : > { %v2180_v23 = vrot.slane %v1764_v46, 1  ;;  %v1079_v45 = vsel %vm1059_vm2, %v1076_v7, %v1078_v1 }
 0x156   : > { %v2024_v26 = vadd.f32 %v1643_v29, %v1435_v48  ;;  %v1179_v51 = vadd.f32 %v1079_v45, %v5086_v58 }
 0x157   : > { %v2181_v30 = vsel %vm1059_vm2, %v2178_v10, %v2180_v23 }
 0x158   : > { %v854_v17 = vpop.f32.mrf.mxu2  ;;  %v5182_v15 = vadd.f32 %v2179_v42, %v2024_v26  ;;  %v4536_v26 = vld [vmem:[%s4857_s13 + $0x84] sm:$0xff]  }
 0x159   : > { %v1335_v55 = vrot.slane %v854_v17, 2  ;;  %v1648_v21 = vpop.f32.mrf.mxu3 }
 0x15a   : > { %v728_v14 = vpop.f32.mrf.mxu1 }
 0x15b   : > { %v1336_v53 = vsel %vm1316_vm3, %v1333_v4, %v1335_v55  ;;  %v1080_v25 = vrot.slane %v728_v14, 1 }
 0x15c   : > { %v1767_v22 = vpop.f32.mrf.mxu0  ;;  %v1436_v57 = vadd.f32 %v1336_v53, %v1179_v51 }
 0x15d   : > { %3979 = vmatmul.msk.bf16.gmra.mxu1 %vm493_vm1, %v4905_v27  ;;  %4003 = vmatmul.msk.bf16.gmra.mxu2 %vm493_vm1, %v4905_v27  ;;  %v2182_v42 = vrot.slane %v1767_v22, 1 }
 0x15e   : > { %v2025_v29 = vadd.f32 %v1646_v5, %v1436_v57  ;;  %4029 = vmatmul.msk.bf16.gmra.mxu3 %vm493_vm1, %v4534_v8 }
 0x15f   : > { %4053 = vmatmul.msk.bf16.gmra.mxu0 %vm493_vm1, %v4534_v8 }
 0x160   : > { %v857_v7 = vpop.f32.mrf.mxu2  ;;  %v5193_v10 = vadd.f32 %v2181_v30, %v2025_v29 }
 0x161   : > { %v1650_v58 = vpop.f32.mrf.mxu3  ;;  %v1337_v5 = vrot.slane %v857_v7, 2 }
 0x162   : > { %v730_v34 = vpop.f32.mrf.mxu1 }
 0x163   : > { %v1081_v4 = vrot.slane %v730_v34, 1 }
 0x164   : > { %v1769_v60 = vpop.f32.mrf.mxu0 }
 0x165   : > { %v2183_v47 = vrot.slane %v1769_v60, 1  ;;  %v1082_v39 = vsel %vm1059_vm2, %v1080_v25, %v1081_v4 }
 0x166   : > { %v1180_v23 = vadd.f32 %v1082_v39, %v4996_v59 }
 0x167   : > { %v2184_v27 = vsel %vm1059_vm2, %v2182_v42, %v2183_v47 }
 0x168   : > { %v859_v1 = vpop.f32.mrf.mxu2 }
 0x169   : > { %v1338_v46 = vrot.slane %v859_v1, 2  ;;  %v1652_v48 = vpop.f32.mrf.mxu3 }
 0x16a   : > { %v733_v45 = vpop.f32.mrf.mxu1 }
 0x16b   : > { %v1339_v30 = vsel %vm1316_vm3, %v1337_v5, %v1338_v46  ;;  %v1083_v17 = vrot.slane %v733_v45, 1  ;;  %v4538_v5 = vld [vmem:[%s4857_s13 + $0x8c] sm:$0xff]  }
 0x16c   : > { %v1772_v55 = vpop.f32.mrf.mxu0  ;;  %v1437_v21 = vadd.f32 %v1339_v30, %v1180_v23 }
 0x16d   : > { %v2185_v51 = vrot.slane %v1772_v55, 1  ;;  %v1084_v14 = vsel %vm1059_vm2, %v1081_v4, %v1083_v17  ;;  %3980 = vmatmul.msk.bf16.gmra.mxu1 %vm493_vm1, %v4922_v31  ;;  %4004 = vmatmul.msk.bf16.gmra.mxu2 %vm493_vm1, %v4922_v31 }
 0x16e   : > { %v2026_v8 = vadd.f32 %v1650_v58, %v1437_v21  ;;  %4030 = vmatmul.msk.bf16.gmra.mxu3 %vm493_vm1, %v4536_v26  ;;  %v1181_v7 = vadd.f32 %v1084_v14, %v5009_v0 }
 0x16f   : > { %v2186_v53 = vsel %vm1059_vm2, %v2183_v47, %v2185_v51  ;;  %4054 = vmatmul.msk.bf16.gmra.mxu0 %vm493_vm1, %v4536_v26 }
 0x170   : > { %v862_v59 = vpop.f32.mrf.mxu2  ;;  %v5208_v22 = vadd.f32 %v2184_v27, %v2026_v8 }
 0x171   : > { %v1340_v57 = vrot.slane %v862_v59, 2  ;;  %v1655_v29 = vpop.f32.mrf.mxu3 }
 0x172   : > { %v735_v42 = vpop.f32.mrf.mxu1 }
 0x173   : > { %v1341_v34 = vsel %vm1316_vm3, %v1338_v46, %v1340_v57  ;;  %v1085_v1 = vrot.slane %v735_v42, 1 }
 0x174   : > { %v1774_v25 = vpop.f32.mrf.mxu0  ;;  %v1438_v31 = vadd.f32 %v1341_v34, %v1181_v7 }
 0x175   : > { %v2187_v45 = vrot.slane %v1774_v25, 1 }
 0x176   : > { %v2027_v58 = vadd.f32 %v1652_v48, %v1438_v31 }
 0x178   : > { %v864_v4 = vpop.f32.mrf.mxu2  ;;  %v5212_v60 = vadd.f32 %v2186_v53, %v2027_v58 }
 0x179   : > { %v1656_v47 = vpop.f32.mrf.mxu3  ;;  %v1342_v48 = vrot.slane %v864_v4, 2  ;;  %v4540_v4 = vld [vmem:[%s4857_s13 + $0x94] sm:$0xff]  }
 0x17a   : > { %v738_v39 = vpop.f32.mrf.mxu1 }
 0x17b   : > { %v1086_v23 = vrot.slane %v738_v39, 1 }
 0x17c   : > { %v1777_v27 = vpop.f32.mrf.mxu0 }
 0x17d   : > { %v2188_v26 = vrot.slane %v1777_v27, 1  ;;  %v1087_v30 = vsel %vm1059_vm2, %v1085_v1, %v1086_v23  ;;  %3981 = vmatmul.msk.bf16.gmra.mxu1 %vm493_vm1, %v4942_v35  ;;  %4005 = vmatmul.msk.bf16.gmra.mxu2 %vm493_vm1, %v4942_v35 }
 0x17e   : > { %4031 = vmatmul.msk.bf16.gmra.mxu3 %vm493_vm1, %v4538_v5  ;;  %v1182_v21 = vadd.f32 %v1087_v30, %v5024_v9 }
 0x17f   : > { %v2189_v0 = vsel %vm1059_vm2, %v2187_v45, %v2188_v26  ;;  %4055 = vmatmul.msk.bf16.gmra.mxu0 %vm493_vm1, %v4538_v5 }
 0x180   : > { %v867_v46 = vpop.f32.mrf.mxu2 }
 0x181   : > { %v1343_v17 = vrot.slane %v867_v46, 2  ;;  %v1659_v55 = vpop.f32.mrf.mxu3 }
 0x182   : > { %v740_v51 = vpop.f32.mrf.mxu1 }
 0x183   : > { %v1344_v14 = vsel %vm1316_vm3, %v1342_v48, %v1343_v17  ;;  %v1088_v8 = vrot.slane %v740_v51, 1 }
 0x184   : > { %v1779_v53 = vpop.f32.mrf.mxu0  ;;  %v1439_v59 = vadd.f32 %v1344_v14, %v1182_v21 }
 0x185   : > { %v2190_v35 = vrot.slane %v1779_v53, 1  ;;  %v1089_v57 = vsel %vm1059_vm2, %v1086_v23, %v1088_v8 }
 0x186   : > { %v2028_v29 = vadd.f32 %v1656_v47, %v1439_v59  ;;  %v1183_v9 = vadd.f32 %v1089_v57, %v5032_v13  ;;  %v4542_v59 = vld [vmem:[%s4857_s13 + $0x9c] sm:$0xff]  }
 0x187   : > { %v2191_v7 = vsel %vm1059_vm2, %v2188_v26, %v2190_v35 }
 0x188   : > { %v869_v42 = vpop.f32.mrf.mxu2  ;;  %v5227_v34 = vadd.f32 %v2189_v0, %v2028_v29 }
 0x189   : > { %v1345_v25 = vrot.slane %v869_v42, 2  ;;  %v1661_v31 = vpop.f32.mrf.mxu3 }
 0x18a   : > { %v743_v58 = vpop.f32.mrf.mxu1 }
 0x18b   : > { %v1346_v39 = vsel %vm1316_vm3, %v1343_v17, %v1345_v25  ;;  %v1090_v30 = vrot.slane %v743_v58, 1 }
 0x18c   : > { %v1782_v5 = vpop.f32.mrf.mxu0  ;;  %v1440_v1 = vadd.f32 %v1346_v39, %v1183_v9 }
 0x18d   : > { %3982 = vmatmul.msk.bf16.gmra.mxu1 %vm493_vm1, %v4972_v54  ;;  %4006 = vmatmul.msk.bf16.gmra.mxu2 %vm493_vm1, %v4972_v54  ;;  %v2192_v45 = vrot.slane %v1782_v5, 1 }
 0x18e   : > { %v2029_v47 = vadd.f32 %v1659_v55, %v1440_v1  ;;  %4032 = vmatmul.msk.bf16.gmra.mxu3 %vm493_vm1, %v4540_v4 }
 0x18f   : > { %4056 = vmatmul.msk.bf16.gmra.mxu0 %vm493_vm1, %v4540_v4 }
 0x190   : > { %v872_v23 = vpop.f32.mrf.mxu2  ;;  %v5238_v27 = vadd.f32 %v2191_v7, %v2029_v47 }
 0x191   : > { %v1663_v13 = vpop.f32.mrf.mxu3  ;;  %v1347_v55 = vrot.slane %v872_v23, 2 }
 0x192   : > { %v745_v26 = vpop.f32.mrf.mxu1 }
 0x193   : > { %v1091_v0 = vrot.slane %v745_v26, 1 }
 0x194   : > { %v1784_v46 = vpop.f32.mrf.mxu0 }
 0x195   : > { %v2193_v48 = vrot.slane %v1784_v46, 1  ;;  %v1092_v17 = vsel %vm1059_vm2, %v1090_v30, %v1091_v0  ;;  %v4544_v46 = vld [vmem:[%s4857_s13 + $0xa4] sm:$0xff]  }
 0x196   : > { %v1184_v8 = vadd.f32 %v1092_v17, %v5047_v36 }
 0x197   : > { %v2194_v54 = vsel %vm1059_vm2, %v2192_v45, %v2193_v48 }
 0x198   : > { %v874_v21 = vpop.f32.mrf.mxu2 }
 0x199   : > { %v1348_v51 = vrot.slane %v874_v21, 2  ;;  %v1665_v14 = vpop.f32.mrf.mxu3 }
 0x19a   : > { %v748_v53 = vpop.f32.mrf.mxu1 }
 0x19b   : > { %v1349_v35 = vsel %vm1316_vm3, %v1347_v55, %v1348_v51  ;;  %v1093_v57 = vrot.slane %v748_v53, 1 }
 0x19c   : > { %v1787_v29 = vpop.f32.mrf.mxu0  ;;  %v1441_v7 = vadd.f32 %v1349_v35, %v1184_v8 }
 0x19d   : > { %v2195_v42 = vrot.slane %v1787_v29, 1  ;;  %v1094_v25 = vsel %vm1059_vm2, %v1091_v0, %v1093_v57  ;;  %3983 = vmatmul.msk.bf16.gmra.mxu1 %vm493_vm1, %v4866_v18  ;;  %4007 = vmatmul.msk.bf16.gmra.mxu2 %vm493_vm1, %v4866_v18 }
 0x19e   : > { %v2030_v31 = vadd.f32 %v1663_v13, %v1441_v7  ;;  %4033 = vmatmul.msk.bf16.gmra.mxu3 %vm493_vm1, %v4542_v59  ;;  %v1185_v5 = vadd.f32 %v1094_v25, %v5060_v41 }
 0x19f   : > { %v2196_v9 = vsel %vm1059_vm2, %v2193_v48, %v2195_v42  ;;  %4057 = vmatmul.msk.bf16.gmra.mxu0 %vm493_vm1, %v4542_v59 }
 0x1a0   : > { %v877_v36 = vpop.f32.mrf.mxu2  ;;  %v5253_v58 = vadd.f32 %v2194_v54, %v2030_v31 }
 0x1a1   : > { %v1350_v4 = vrot.slane %v877_v36, 2  ;;  %v1668_v39 = vpop.f32.mrf.mxu3 }
 0x1a2   : > { %v750_v1 = vpop.f32.mrf.mxu1 }
 0x1a3   : > { %v1351_v47 = vsel %vm1316_vm3, %v1348_v51, %v1350_v4  ;;  %v1095_v48 = vrot.slane %v750_v1, 1 }
 0x1a4   : > { %v1789_v23 = vpop.f32.mrf.mxu0  ;;  %v1442_v18 = vadd.f32 %v1351_v47, %v1185_v5 }
 0x1a5   : > { %v2197_v55 = vrot.slane %v1789_v23, 1  ;;  %v4546_v23 = vld [vmem:[%s4857_s13 + $0xac] sm:$0xff]  }
 0x1a6   : > { %v2031_v13 = vadd.f32 %v1665_v14, %v1442_v18 }
 0x1a8   : > { %v879_v45 = vpop.f32.mrf.mxu2  ;;  %v5257_v26 = vadd.f32 %v2196_v9, %v2031_v13 }
 0x1a9   : > { %v1669_v30 = vpop.f32.mrf.mxu3  ;;  %v1352_v14 = vrot.slane %v879_v45, 2 }
 0x1aa   : > { %v753_v0 = vpop.f32.mrf.mxu1 }
 0x1ab   : > { %v1096_v17 = vrot.slane %v753_v0, 1 }
 0x1ac   : > { %v1792_v54 = vpop.f32.mrf.mxu0 }
 0x1ad   : > { %v2198_v21 = vrot.slane %v1792_v54, 1  ;;  %v1097_v8 = vsel %vm1059_vm2, %v1095_v48, %v1096_v17  ;;  %3984 = vmatmul.msk.bf16.gmra.mxu1 %vm493_vm1, %v4888_v24  ;;  %4008 = vmatmul.msk.bf16.gmra.mxu2 %vm493_vm1, %v4888_v24 }
 0x1ae   : > { %4034 = vmatmul.msk.bf16.gmra.mxu3 %vm493_vm1, %v4544_v46  ;;  %v1186_v35 = vadd.f32 %v1097_v8, %v5075_v50 }
 0x1af   : > { %v2199_v41 = vsel %vm1059_vm2, %v2197_v55, %v2198_v21  ;;  %4058 = vmatmul.msk.bf16.gmra.mxu0 %vm493_vm1, %v4544_v46 }
 0x1b0   : > { %v882_v51 = vpop.f32.mrf.mxu2 }
 0x1b1   : > { %v1353_v53 = vrot.slane %v882_v51, 2  ;;  %v1672_v59 = vpop.f32.mrf.mxu3 }
 0x1b2   : > { %v755_v57 = vpop.f32.mrf.mxu1 }
 0x1b3   : > { %v1354_v29 = vsel %vm1316_vm3, %v1352_v14, %v1353_v53  ;;  %v1098_v7 = vrot.slane %v755_v57, 1 }
 0x1b4   : > { %v1794_v42 = vpop.f32.mrf.mxu0  ;;  %v1443_v25 = vadd.f32 %v1354_v29, %v1186_v35  ;;  %v4547_v29 = vld [vmem:[%s4857_s13 + $0xb4] sm:$0xff]  }
 0x1b5   : > { %v2200_v24 = vrot.slane %v1794_v42, 1  ;;  %v1099_v31 = vsel %vm1059_vm2, %v1096_v17, %v1098_v7 }
 0x1b6   : > { %v2032_v9 = vadd.f32 %v1669_v30, %v1443_v25  ;;  %v1187_v50 = vadd.f32 %v1099_v31, %v5083_v56 }
 0x1b7   : > { %v2201_v36 = vsel %vm1059_vm2, %v2198_v21, %v2200_v24 }
 0x1b8   : > { %v884_v4 = vpop.f32.mrf.mxu2  ;;  %v5272_v39 = vadd.f32 %v2199_v41, %v2032_v9 }
 0x1b9   : > { %v1355_v5 = vrot.slane %v884_v4, 2  ;;  %v1674_v1 = vpop.f32.mrf.mxu3 }
 0x1ba   : > { %v758_v47 = vpop.f32.mrf.mxu1 }
 0x1bb   : > { %v1356_v18 = vsel %vm1316_vm3, %v1353_v53, %v1355_v5  ;;  %v1100_v54 = vrot.slane %v758_v47, 1 }
 0x1bc   : > { %v1797_v13 = vpop.f32.mrf.mxu0  ;;  %v1444_v45 = vadd.f32 %v1356_v18, %v1187_v50 }
 0x1bd   : > { %3985 = vmatmul.msk.bf16.gmra.mxu1 %vm493_vm1, %v4908_v28  ;;  %4009 = vmatmul.msk.bf16.gmra.mxu2 %vm493_vm1, %v4908_v28  ;;  %v2202_v48 = vrot.slane %v1797_v13, 1 }
 0x1be   : > { %v2033_v30 = vadd.f32 %v1672_v59, %v1444_v45  ;;  %4035 = vmatmul.msk.bf16.gmra.mxu3 %vm493_vm1, %v4546_v23 }
 0x1bf   : > { %4059 = vmatmul.msk.bf16.gmra.mxu0 %vm493_vm1, %v4546_v23 }
 0x1c0   : > { %v887_v0 = vpop.f32.mrf.mxu2  ;;  %v5283_v46 = vadd.f32 %v2201_v36, %v2033_v30  ;;  %v4561_v30 = vld [vmem:[%s4857_s13 + $0xbc] sm:$0xf] }
 0x1c1   : > { %v1676_v56 = vpop.f32.mrf.mxu3  ;;  %v1357_v51 = vrot.slane %v887_v0, 2  ;;  %v4563_v0 = vld [vmem:[%s5307_s7 - $0x4] sm:$0xf0]  }
 0x1c2   : > { %v760_v17 = vpop.f32.mrf.mxu1 }
 0x1c3   : > { %v1101_v55 = vrot.slane %v760_v17, 1 }
 0x1c4   : > { %v1799_v21 = vpop.f32.mrf.mxu0 }
 0x1c5   : > { %v2203_v8 = vrot.slane %v1799_v21, 1  ;;  %v1102_v41 = vsel %vm1059_vm2, %v1100_v54, %v1101_v55  ;;  %v5313_v54 = vor.u32 %v4563_v0, %v4561_v30 }
 0x1c6   : > { %v1188_v35 = vadd.f32 %v1102_v41, %v5005_v62 }
 0x1c7   : > { %v2204_v28 = vsel %vm1059_vm2, %v2202_v48, %v2203_v8 }
 0x1c8   : > { %v889_v14 = vpop.f32.mrf.mxu2 }
 0x1c9   : > { %v1358_v53 = vrot.slane %v889_v14, 2  ;;  %v1678_v59 = vpop.f32.mrf.mxu3  ;;  %v4626_v14 = vld [vmem:[%s4857_s13 + $0xb0] sm:$0xff]  }
 0x1ca   : > { %v763_v57 = vpop.f32.mrf.mxu1 }
 0x1cb   : > { %v1359_v7 = vsel %vm1316_vm3, %v1357_v51, %v1358_v53  ;;  %v1103_v42 = vrot.slane %v763_v57, 1 }
 0x1cc   : > { %v1802_v25 = vpop.f32.mrf.mxu0  ;;  %v1445_v24 = vadd.f32 %v1359_v7, %v1188_v35 }
 0x1cd   : > { %v2205_v31 = vrot.slane %v1802_v25, 1  ;;  %v1104_v9 = vsel %vm1059_vm2, %v1101_v55, %v1103_v42  ;;  %3986 = vmatmul.msk.bf16.gmra.mxu1 %vm493_vm1, %v4925_v32  ;;  %4010 = vmatmul.msk.bf16.gmra.mxu2 %vm493_vm1, %v4925_v32 }
 0x1ce   : > { %v2034_v36 = vadd.f32 %v1676_v56, %v1445_v24  ;;  %4036 = vmatmul.msk.bf16.gmra.mxu3 %vm493_vm1, %v4547_v29  ;;  %v1189_v47 = vadd.f32 %v1104_v9, %v5013_v2 }
 0x1cf   : > { %v2206_v62 = vsel %vm1059_vm2, %v2203_v8, %v2205_v31  ;;  %4060 = vmatmul.msk.bf16.gmra.mxu0 %vm493_vm1, %v4547_v29 }
 0x1d0   : > { %v892_v4 = vpop.f32.mrf.mxu2  ;;  %v5298_v5 = vadd.f32 %v2204_v28, %v2034_v36 }
 0x1d1   : > { %v1360_v1 = vrot.slane %v892_v4, 2  ;;  %v1681_v50 = vpop.f32.mrf.mxu3 }
 0x1d2   : > { %v765_v23 = vpop.f32.mrf.mxu1 }
 0x1d3   : > { %v1361_v32 = vsel %vm1316_vm3, %v1358_v53, %v1360_v1  ;;  %v1105_v55 = vrot.slane %v765_v23, 1 }
 0x1d4   : > { %v1804_v18 = vpop.f32.mrf.mxu0  ;;  %v1446_v13 = vadd.f32 %v1361_v32, %v1189_v47 }
 0x1d5   : > { %v2207_v41 = vrot.slane %v1804_v18, 1 }
 0x1d6   : > { %v2035_v45 = vadd.f32 %v1678_v59, %v1446_v13  ;;  %v4564_v13 = vld [vmem:[%s5307_s7 + $0x4] sm:$0xff]  }
 0x1d8   : > { %v894_v56 = vpop.f32.mrf.mxu2  ;;  %v5311_v48 = vadd.f32 %v2206_v62, %v2035_v45 }
 0x1d9   : > { %v1682_v17 = vpop.f32.mrf.mxu3  ;;  %v1362_v35 = vrot.slane %v894_v56, 2  ;;  %v4627_v56 = vld [vmem:[%s4857_s13 + $0xb8] sm:$0xff]  }
 0x1da   : > { %v768_v2 = vpop.f32.mrf.mxu1 }
 0x1db   : > { %v1106_v21 = vrot.slane %v768_v2, 1 }
 0x1dc   : > { %v1807_v8 = vpop.f32.mrf.mxu0 }
 0x1dd   : > { %v2208_v28 = vrot.slane %v1807_v8, 1  ;;  %v1107_v51 = vsel %vm1059_vm2, %v1105_v55, %v1106_v21  ;;  %3987 = vmatmul.msk.bf16.gmra.mxu1 %vm493_vm1, %v4626_v14  ;;  %4011 = vmatmul.msk.bf16.gmra.mxu2 %vm493_vm1, %v4626_v14 }
 0x1de   : > { %4037 = vmatmul.msk.bf16.gmra.mxu3 %vm493_vm1, %v5313_v54  ;;  %v1190_v7 = vadd.f32 %v1107_v51, %v5028_v11 }
 0x1df   : > { %v2209_v53 = vsel %vm1059_vm2, %v2207_v41, %v2208_v28  ;;  %4061 = vmatmul.msk.bf16.gmra.mxu0 %vm493_vm1, %v5313_v54 }
 0x1e0   : > { %v897_v59 = vpop.f32.mrf.mxu2 }
 0x1e1   : > { %v1363_v57 = vrot.slane %v897_v59, 2  ;;  %v1685_v29 = vpop.f32.mrf.mxu3 }
 0x1e2   : > { %v770_v42 = vpop.f32.mrf.mxu1 }
 0x1e3   : > { %v1364_v25 = vsel %vm1316_vm3, %v1362_v35, %v1363_v57  ;;  %v1108_v24 = vrot.slane %v770_v42, 1 }
 0x1e4   : > { %v1809_v31 = vpop.f32.mrf.mxu0  ;;  %v1447_v9 = vadd.f32 %v1364_v25, %v1190_v7 }
 0x1e5   : > { %v2210_v36 = vrot.slane %v1809_v31, 1  ;;  %v1109_v62 = vsel %vm1059_vm2, %v1106_v21, %v1108_v24 }
 0x1e6   : > { %v2036_v4 = vadd.f32 %v1682_v17, %v1447_v9  ;;  %v1191_v11 = vadd.f32 %v1109_v62, %v5043_v19 }
 0x1e7   : > { %v2211_v1 = vsel %vm1059_vm2, %v2208_v28, %v2210_v36 }
 0x1e8   : > { %v899_v50 = vpop.f32.mrf.mxu2  ;;  %v5328_v47 = vadd.f32 %v2209_v53, %v2036_v4 }
 0x1e9   : > { %v1365_v23 = vrot.slane %v899_v50, 2  ;;  %v1687_v32 = vpop.f32.mrf.mxu3  ;;  %v4629_v50 = vld [vmem:[%s4857_s13 + $0x18] sm:$0xff]  }
 0x1ea   : > { %v773_v18 = vpop.f32.mrf.mxu1 }
 0x1eb   : > { %v1366_v45 = vsel %vm1316_vm3, %v1363_v57, %v1365_v23  ;;  %v1110_v41 = vrot.slane %v773_v18, 1 }
 0x1ec   : > { %v1812_v30 = vpop.f32.mrf.mxu0  ;;  %v1448_v0 = vadd.f32 %v1366_v45, %v1191_v11 }
 0x1ed   : > { %3988 = vmatmul.msk.bf16.gmra.mxu1 %vm493_vm1, %v4627_v56  ;;  %4012 = vmatmul.msk.bf16.gmra.mxu2 %vm493_vm1, %v4627_v56  ;;  %v2212_v21 = vrot.slane %v1812_v30, 1 }
 0x1ee   : > { %v2037_v17 = vadd.f32 %v1685_v29, %v1448_v0  ;;  %4038 = vmatmul.msk.bf16.gmra.mxu3 %vm493_vm1, %v4564_v13 }
 0x1ef   : > { %4062 = vmatmul.msk.bf16.gmra.mxu0 %vm493_vm1, %v4564_v13 }
 0x1f0   : > { %v902_v2 = vpop.f32.mrf.mxu2  ;;  %v5338_v55 = vadd.f32 %v2211_v1, %v2037_v17  ;;  %v4628_v1 = vld [vmem:[%s4857_s13 + $0xc] sm:$0xff]  }
 0x1f1   : > { %v1689_v19 = vpop.f32.mrf.mxu3  ;;  %v1367_v35 = vrot.slane %v902_v2, 2 }
 0x1f2   : > { %v775_v8 = vpop.f32.mrf.mxu1 }
 0x1f3   : > { %v1111_v28 = vrot.slane %v775_v8, 1 }
 0x1f4   : > { %v1814_v51 = vpop.f32.mrf.mxu0 }
 0x1f5   : > { %v2213_v14 = vrot.slane %v1814_v51, 1  ;;  %v1112_v53 = vsel %vm1059_vm2, %v1110_v41, %v1111_v28 }
 0x1f6   : > { %v1192_v42 = vadd.f32 %v1112_v53, %v5056_v37 }
 0x1f7   : > { %v2214_v59 = vsel %vm1059_vm2, %v2212_v21, %v2213_v14 }
 0x1f8   : > { %v904_v57 = vpop.f32.mrf.mxu2 }
 0x1f9   : > { %v1368_v29 = vrot.slane %v904_v57, 2  ;;  %v1691_v7 = vpop.f32.mrf.mxu3  ;;  %v4631_v57 = vld [vmem:[%s4857_s13 + $0x20] sm:$0xff]  }
 0x1fa   : > { %v778_v25 = vpop.f32.mrf.mxu1 }
 0x1fb   : > { %v1369_v24 = vsel %vm1316_vm3, %v1367_v35, %v1368_v29  ;;  %v1113_v31 = vrot.slane %v778_v25, 1  ;;  %v4630_v35 = vld [vmem:[%s4857_s13 + $0x14] sm:$0xff]  }
 0x1fc   : > { %v1817_v9 = vpop.f32.mrf.mxu0  ;;  %v1449_v36 = vadd.f32 %v1369_v24, %v1192_v42 }
 0x1fd   : > { %v2215_v62 = vrot.slane %v1817_v9, 1  ;;  %v1114_v4 = vsel %vm1059_vm2, %v1111_v28, %v1113_v31  ;;  %4063 = vmatmul.msk.bf16.vlgmr.msra.gmra.mxu1 %vm493_vm1, %v4628_v1  ;;  %4093 = vmatmul.msk.bf16.vlgmr.msra.gmra.mxu2 %vm493_vm1, %v4629_v50 }
 0x1fe   : > { %v2038_v23 = vadd.f32 %v1689_v19, %v1449_v36  ;;  %4117 = vmatmul.msk.bf16.vlgmr.msra.gmra.mxu3 %vm493_vm1, %v4629_v50  ;;  %v1193_v45 = vadd.f32 %v1114_v4, %v5064_v43 }
 0x1ff   : > { %v2216_v32 = vsel %vm1059_vm2, %v2213_v14, %v2215_v62  ;;  %4141 = vmatmul.msk.bf16.vlgmr.msra.gmra.mxu0 %vm493_vm1, %v4629_v50 }
 0x200   : > { %v907_v37 = vpop.f32.mrf.mxu2  ;;  %v5352_v11 = vadd.f32 %v2214_v59, %v2038_v23 }
 0x201   : > { %v1370_v18 = vrot.slane %v907_v37, 2  ;;  %v1694_v13 = vpop.f32.mrf.mxu3 }
 0x202   : > { %v780_v30 = vpop.f32.mrf.mxu1 }
 0x203   : > { %v1371_v0 = vsel %vm1316_vm3, %v1368_v29, %v1370_v18  ;;  %v1115_v28 = vrot.slane %v780_v30, 1 }
 0x204   : > { %v1819_v56 = vpop.f32.mrf.mxu0  ;;  %v1450_v17 = vadd.f32 %v1371_v0, %v1193_v45 }
 0x205   : > { %v2217_v53 = vrot.slane %v1819_v56, 1 }
 0x206   : > { %v2039_v2 = vadd.f32 %v1691_v7, %v1450_v17 }
 0x208   : > { %v909_v19 = vpop.f32.mrf.mxu2  ;;  %v5356_v21 = vadd.f32 %v2216_v32, %v2039_v2 }
 0x209   : > { %v1695_v8 = vpop.f32.mrf.mxu3  ;;  %v1372_v42 = vrot.slane %v909_v19, 2  ;;  %v4632_v19 = vld [vmem:[%s4857_s13 + $0x1c] sm:$0xff]  }
 0x20a   : > { %v783_v41 = vpop.f32.mrf.mxu1 }
 0x20b   : > { %v1116_v51 = vrot.slane %v783_v41, 1  ;;  %v4633_v41 = vld [vmem:[%s4857_s13 + $0x28] sm:$0xff]  }
 0x20c   : > { %v1822_v14 = vpop.f32.mrf.mxu0 }
 0x20d   : > { %v2218_v59 = vrot.slane %v1822_v14, 1  ;;  %v1117_v43 = vsel %vm1059_vm2, %v1115_v28, %v1116_v51  ;;  %4064 = vmatmul.msk.bf16.gmra.mxu1 %vm493_vm1, %v4630_v35  ;;  %4094 = vmatmul.msk.bf16.gmra.mxu2 %vm493_vm1, %v4631_v57 }
 0x20e   : > { %4118 = vmatmul.msk.bf16.gmra.mxu3 %vm493_vm1, %v4631_v57  ;;  %v1194_v31 = vadd.f32 %v1117_v43, %v5079_v52 }
 0x20f   : > { %v2219_v29 = vsel %vm1059_vm2, %v2217_v53, %v2218_v59  ;;  %4142 = vmatmul.msk.bf16.gmra.mxu0 %vm493_vm1, %v4631_v57 }
 0x210   : > { %v912_v7 = vpop.f32.mrf.mxu2 }
 0x211   : > { %v1373_v25 = vrot.slane %v912_v7, 2  ;;  %v1698_v24 = vpop.f32.mrf.mxu3 }
 0x212   : > { %v785_v9 = vpop.f32.mrf.mxu1 }
 0x213   : > { %v1374_v36 = vsel %vm1316_vm3, %v1372_v42, %v1373_v25  ;;  %v1118_v62 = vrot.slane %v785_v9, 1 }
 0x214   : > { %v1824_v4 = vpop.f32.mrf.mxu0  ;;  %v1451_v1 = vadd.f32 %v1374_v36, %v1194_v31 }
 0x215   : > { %v2220_v50 = vrot.slane %v1824_v4, 1  ;;  %v1119_v23 = vsel %vm1059_vm2, %v1116_v51, %v1118_v62 }
 0x216   : > { %v2040_v32 = vadd.f32 %v1695_v8, %v1451_v1  ;;  %v1195_v52 = vadd.f32 %v1119_v23, %v5094_v16 }
 0x217   : > { %v2221_v37 = vsel %vm1059_vm2, %v2218_v59, %v2220_v50 }
 0x218   : > { %v914_v18 = vpop.f32.mrf.mxu2  ;;  %v5370_v13 = vadd.f32 %v2219_v29, %v2040_v32 }
 0x219   : > { %v1375_v45 = vrot.slane %v914_v18, 2  ;;  %v1700_v30 = vpop.f32.mrf.mxu3  ;;  %v4635_v18 = vld [vmem:[%s4857_s13 + $0x30] sm:$0xff]  }
 0x21a   : > { %v788_v0 = vpop.f32.mrf.mxu1 }
 0x21b   : > { %v1376_v56 = vsel %vm1316_vm3, %v1373_v25, %v1375_v45  ;;  %v1120_v59 = vrot.slane %v788_v0, 1 }
 0x21c   : > { %v1827_v17 = vpop.f32.mrf.mxu0  ;;  %v1452_v2 = vadd.f32 %v1376_v56, %v1195_v52 }
 0x21d   : > { %4065 = vmatmul.msk.bf16.gmra.mxu1 %vm493_vm1, %v4632_v19  ;;  %4095 = vmatmul.msk.bf16.gmra.mxu2 %vm493_vm1, %v4633_v41  ;;  %v2222_v14 = vrot.slane %v1827_v17, 1 }
 0x21e   : > { %v2041_v8 = vadd.f32 %v1698_v24, %v1452_v2  ;;  %4119 = vmatmul.msk.bf16.gmra.mxu3 %vm493_vm1, %v4633_v41 }
 0x21f   : > { %4143 = vmatmul.msk.bf16.gmra.mxu0 %vm493_vm1, %v4633_v41 }
 0x220   : > { %v917_v28 = vpop.f32.mrf.mxu2  ;;  %v5380_v51 = vadd.f32 %v2221_v37, %v2041_v8  ;;  %v4634_v37 = vld [vmem:[%s4857_s13 + $0x24] sm:$0xff]  }
 0x221   : > { %v1702_v16 = vpop.f32.mrf.mxu3  ;;  %v1377_v42 = vrot.slane %v917_v28, 2 }
 0x222   : > { %v790_v53 = vpop.f32.mrf.mxu1 }
 0x223   : > { %v1121_v43 = vrot.slane %v790_v53, 1 }
 0x224   : > { %v1829_v35 = vpop.f32.mrf.mxu0 }
 0x225   : > { %v2223_v57 = vrot.slane %v1829_v35, 1  ;;  %v1122_v29 = vsel %vm1059_vm2, %v1120_v59, %v1121_v43 }
 0x226   : > { %v1196_v9 = vadd.f32 %v1122_v29, %v5007_v63 }
 0x227   : > { %v2224_v7 = vsel %vm1059_vm2, %v2222_v14, %v2223_v57 }
 0x228   : > { %v919_v25 = vpop.f32.mrf.mxu2 }
 0x229   : > { %v1378_v24 = vrot.slane %v919_v25, 2  ;;  %v1704_v31 = vpop.f32.mrf.mxu3  ;;  %v4637_v25 = vld [vmem:[%s4857_s13 + $0x38] sm:$0xff]  }
 0x22a   : > { %v793_v36 = vpop.f32.mrf.mxu1 }
 0x22b   : > { %v1379_v62 = vsel %vm1316_vm3, %v1377_v42, %v1378_v24  ;;  %v1123_v4 = vrot.slane %v793_v36, 1  ;;  %v4636_v42 = vld [vmem:[%s4857_s13 + $0x2c] sm:$0xff]  }
 0x22c   : > { %v1832_v1 = vpop.f32.mrf.mxu0  ;;  %v1453_v50 = vadd.f32 %v1379_v62, %v1196_v9 }
 0x22d   : > { %v2225_v23 = vrot.slane %v1832_v1, 1  ;;  %v1124_v32 = vsel %vm1059_vm2, %v1121_v43, %v1123_v4  ;;  %4066 = vmatmul.msk.bf16.gmra.mxu1 %vm493_vm1, %v4634_v37  ;;  %4096 = vmatmul.msk.bf16.gmra.mxu2 %vm493_vm1, %v4635_v18 }
 0x22e   : > { %v2042_v45 = vadd.f32 %v1702_v16, %v1453_v50  ;;  %4120 = vmatmul.msk.bf16.gmra.mxu3 %vm493_vm1, %v4635_v18  ;;  %v1197_v17 = vadd.f32 %v1124_v32, %v5015_v3 }
 0x22f   : > { %v2226_v30 = vsel %vm1059_vm2, %v2223_v57, %v2225_v23  ;;  %4144 = vmatmul.msk.bf16.gmra.mxu0 %vm493_vm1, %v4635_v18 }
 0x230   : > { %v922_v63 = vpop.f32.mrf.mxu2  ;;  %v5394_v52 = vadd.f32 %v2224_v7, %v2042_v45 }
 0x231   : > { %v1380_v0 = vrot.slane %v922_v63, 2  ;;  %v1707_v56 = vpop.f32.mrf.mxu3 }
 0x232   : > { %v795_v2 = vpop.f32.mrf.mxu1 }
 0x233   : > { %v1381_v19 = vsel %vm1316_vm3, %v1378_v24, %v1380_v0  ;;  %v1125_v43 = vrot.slane %v795_v2, 1 }
 0x234   : > { %v1834_v41 = vpop.f32.mrf.mxu0  ;;  %v1454_v8 = vadd.f32 %v1381_v19, %v1197_v17 }
 0x235   : > { %v2227_v29 = vrot.slane %v1834_v41, 1 }
 0x236   : > { %v2043_v28 = vadd.f32 %v1704_v31, %v1454_v8 }
 0x238   : > { %v924_v16 = vpop.f32.mrf.mxu2  ;;  %v5398_v14 = vadd.f32 %v2226_v30, %v2043_v28 }
 0x239   : > { %v1708_v53 = vpop.f32.mrf.mxu3  ;;  %v1382_v9 = vrot.slane %v924_v16, 2  ;;  %v4638_v16 = vld [vmem:[%s4857_s13 + $0x34] sm:$0xff]  }
 0x23a   : > { %v798_v59 = vpop.f32.mrf.mxu1 }
 0x23b   : > { %v1126_v35 = vrot.slane %v798_v59, 1  ;;  %v4639_v59 = vld [vmem:[%s4857_s13 + $0x40] sm:$0xff]  }
 0x23c   : > { %v1837_v57 = vpop.f32.mrf.mxu0 }
 0x23d   : > { %v2228_v7 = vrot.slane %v1837_v57, 1  ;;  %v1127_v3 = vsel %vm1059_vm2, %v1125_v43, %v1126_v35  ;;  %4067 = vmatmul.msk.bf16.gmra.mxu1 %vm493_vm1, %v4636_v42  ;;  %4097 = vmatmul.msk.bf16.gmra.mxu2 %vm493_vm1, %v4637_v25 }
 0x23e   : > { %4121 = vmatmul.msk.bf16.gmra.mxu3 %vm493_vm1, %v4637_v25  ;;  %v1198_v4 = vadd.f32 %v1127_v3, %v5030_v12 }
 0x23f   : > { %v2229_v24 = vsel %vm1059_vm2, %v2227_v29, %v2228_v7  ;;  %4145 = vmatmul.msk.bf16.gmra.mxu0 %vm493_vm1, %v4637_v25 }
 0x240   : > { %v927_v31 = vpop.f32.mrf.mxu2 }
 0x241   : > { %v1383_v36 = vrot.slane %v927_v31, 2  ;;  %v1711_v62 = vpop.f32.mrf.mxu3 }
 0x242   : > { %v800_v1 = vpop.f32.mrf.mxu1 }
 0x243   : > { %v1384_v50 = vsel %vm1316_vm3, %v1382_v9, %v1383_v36  ;;  %v1128_v23 = vrot.slane %v800_v1, 1 }
 0x244   : > { %v1839_v32 = vpop.f32.mrf.mxu0  ;;  %v1455_v37 = vadd.f32 %v1384_v50, %v1198_v4 }
 0x245   : > { %v2230_v18 = vrot.slane %v1839_v32, 1  ;;  %v1129_v45 = vsel %vm1059_vm2, %v1126_v35, %v1128_v23 }
 0x246   : > { %v2044_v30 = vadd.f32 %v1708_v53, %v1455_v37  ;;  %v1199_v12 = vadd.f32 %v1129_v45, %v5045_v20 }
 0x247   : > { %v2231_v63 = vsel %vm1059_vm2, %v2228_v7, %v2230_v18 }
 0x248   : > { %v929_v0 = vpop.f32.mrf.mxu2  ;;  %v5412_v56 = vadd.f32 %v2229_v24, %v2044_v30 }
 0x249   : > { %v1385_v17 = vrot.slane %v929_v0, 2  ;;  %v1713_v2 = vpop.f32.mrf.mxu3  ;;  %v4641_v0 = vld [vmem:[%s4857_s13 + $0x48] sm:$0xff]  }
 0x24a   : > { %v803_v19 = vpop.f32.mrf.mxu1 }
 0x24b   : > { %v1386_v41 = vsel %vm1316_vm3, %v1383_v36, %v1385_v17  ;;  %v1130_v7 = vrot.slane %v803_v19, 1 }
 0x24c   : > { %v1842_v8 = vpop.f32.mrf.mxu0  ;;  %v1456_v28 = vadd.f32 %v1386_v41, %v1199_v12 }
 0x24d   : > { %4068 = vmatmul.msk.bf16.gmra.mxu1 %vm493_vm1, %v4638_v16  ;;  %4098 = vmatmul.msk.bf16.gmra.mxu2 %vm493_vm1, %v4639_v59  ;;  %v2232_v57 = vrot.slane %v1842_v8, 1 }
 0x24e   : > { %v2045_v53 = vadd.f32 %v1711_v62, %v1456_v28  ;;  %4122 = vmatmul.msk.bf16.gmra.mxu3 %vm493_vm1, %v4639_v59 }
 0x24f   : > { %4146 = vmatmul.msk.bf16.gmra.mxu0 %vm493_vm1, %v4639_v59 }
 0x250   : > { %v932_v43 = vpop.f32.mrf.mxu2  ;;  %v5422_v35 = vadd.f32 %v2231_v63, %v2045_v53  ;;  %v4640_v63 = vld [vmem:[%s4857_s13 + $0x3c] sm:$0xff]  }
 0x251   : > { %v1715_v20 = vpop.f32.mrf.mxu3  ;;  %v1387_v9 = vrot.slane %v932_v43, 2 }
 0x252   : > { %v805_v29 = vpop.f32.mrf.mxu1 }
 0x253   : > { %v1131_v3 = vrot.slane %v805_v29, 1 }
 0x254   : > { %v1844_v42 = vpop.f32.mrf.mxu0 }
 0x255   : > { %v2233_v25 = vrot.slane %v1844_v42, 1  ;;  %v1132_v24 = vsel %vm1059_vm2, %v1130_v7, %v1131_v3 }
 0x256   : > { %v1200_v1 = vadd.f32 %v1132_v24, %v5058_v40 }
 0x257   : > { %v2234_v31 = vsel %vm1059_vm2, %v2232_v57, %v2233_v25 }
 0x258   : > { %v934_v36 = vpop.f32.mrf.mxu2 }
 0x259   : > { %v1388_v62 = vrot.slane %v934_v36, 2  ;;  %v1717_v4 = vpop.f32.mrf.mxu3  ;;  %v4643_v36 = vld [vmem:[%s4857_s13 + $0x50] sm:$0xff]  }
 0x25a   : > { %v808_v50 = vpop.f32.mrf.mxu1 }
 0x25b   : > { %v1389_v23 = vsel %vm1316_vm3, %v1387_v9, %v1388_v62  ;;  %v1133_v32 = vrot.slane %v808_v50, 1  ;;  %v4642_v9 = vld [vmem:[%s4857_s13 + $0x44] sm:$0xff]  }
 0x25c   : > { %v1847_v37 = vpop.f32.mrf.mxu0  ;;  %v1457_v18 = vadd.f32 %v1389_v23, %v1200_v1 }
 0x25d   : > { %v2235_v45 = vrot.slane %v1847_v37, 1  ;;  %v1134_v30 = vsel %vm1059_vm2, %v1131_v3, %v1133_v32  ;;  %4069 = vmatmul.msk.bf16.gmra.mxu1 %vm493_vm1, %v4640_v63  ;;  %4099 = vmatmul.msk.bf16.gmra.mxu2 %vm493_vm1, %v4641_v0  ;;  %v5796_v32 = vld [vmem:[#allocation6_spill] sm:$0xff] }
 0x25e   : > { %v2046_v17 = vadd.f32 %v1715_v20, %v1457_v18  ;;  %4123 = vmatmul.msk.bf16.gmra.mxu3 %vm493_vm1, %v4641_v0  ;;  %v1201_v8 = vadd.f32 %v1134_v30, %v5066_v44 }
 0x25f   : > { %v2236_v2 = vsel %vm1059_vm2, %v2233_v25, %v2235_v45  ;;  %4147 = vmatmul.msk.bf16.gmra.mxu0 %vm493_vm1, %v4641_v0 }
 0x260   : > { %v937_v40 = vpop.f32.mrf.mxu2  ;;  %v5436_v12 = vadd.f32 %v2234_v31, %v2046_v17 }
 0x261   : > { %v1390_v19 = vrot.slane %v937_v40, 2  ;;  %v1720_v41 = vpop.f32.mrf.mxu3 }
 0x262   : > { %v810_v28 = vpop.f32.mrf.mxu1 }
 0x263   : > { %v1391_v16 = vsel %vm1316_vm3, %v1388_v62, %v1390_v19  ;;  %v1135_v3 = vrot.slane %v810_v28, 1 }
 0x264   : > { %v1849_v59 = vpop.f32.mrf.mxu0  ;;  %v1458_v53 = vadd.f32 %v1391_v16, %v1201_v8 }
 0x265   : > { %v2237_v24 = vrot.slane %v1849_v59, 1  ;;  %v5797_v59 = vld [vmem:[#allocation7_spill] sm:$0xff] }
 0x266   : > { %v2047_v43 = vadd.f32 %v1717_v4, %v1458_v53 }
 0x268   : > { %v939_v20 = vpop.f32.mrf.mxu2  ;;  %v5440_v57 = vadd.f32 %v2236_v2, %v2047_v43 }
 0x269   : > { %v1721_v29 = vpop.f32.mrf.mxu3  ;;  %v1392_v1 = vrot.slane %v939_v20, 2 }
 0x26a   : > { %v813_v7 = vpop.f32.mrf.mxu1 }
 0x26b   : > { %v1136_v42 = vrot.slane %v813_v7, 1 }
 0x26c   : > { %v1852_v25 = vpop.f32.mrf.mxu0 }
 0x26d   : > { %v2238_v31 = vrot.slane %v1852_v25, 1  ;;  %v1137_v44 = vsel %vm1059_vm2, %v1135_v3, %v1136_v42  ;;  %4070 = vmatmul.msk.bf16.gmra.mxu1 %vm493_vm1, %v4642_v9  ;;  %4100 = vmatmul.msk.bf16.gmra.mxu2 %vm493_vm1, %v4643_v36  ;;  %v4644_v25 = vld [vmem:[%s4857_s13 + $0x4c] sm:$0xff]  }
 0x26e   : > { %4124 = vmatmul.msk.bf16.gmra.mxu3 %vm493_vm1, %v4643_v36  ;;  %v1202_v37 = vadd.f32 %v1137_v44, %v5796_v32 }
 0x26f   : > { %v2239_v62 = vsel %vm1059_vm2, %v2237_v24, %v2238_v31  ;;  %4148 = vmatmul.msk.bf16.gmra.mxu0 %vm493_vm1, %v4643_v36  ;;  %v4645_v24 = vld [vmem:[%s4857_s13 + $0x58] sm:$0xff]  }
 0x270   : > { %v942_v4 = vpop.f32.mrf.mxu2 }
 0x271   : > { %v1393_v50 = vrot.slane %v942_v4, 2  ;;  %v1724_v23 = vpop.f32.mrf.mxu3 }
 0x272   : > { %v815_v18 = vpop.f32.mrf.mxu1 }
 0x273   : > { %v1394_v45 = vsel %vm1316_vm3, %v1392_v1, %v1393_v50  ;;  %v1138_v30 = vrot.slane %v815_v18, 1 }
 0x274   : > { %v1854_v63 = vpop.f32.mrf.mxu0  ;;  %v1459_v0 = vadd.f32 %v1394_v45, %v1202_v37 }
 0x275   : > { %v2240_v17 = vrot.slane %v1854_v63, 1  ;;  %v1139_v2 = vsel %vm1059_vm2, %v1136_v42, %v1138_v30 }
 0x276   : > { %v2048_v40 = vadd.f32 %v1721_v29, %v1459_v0  ;;  %v1203_v53 = vadd.f32 %v1139_v2, %v5797_v59 }
 0x277   : > { %v2241_v19 = vsel %vm1059_vm2, %v2238_v31, %v2240_v17 }
 0x278   : > { %v944_v41 = vpop.f32.mrf.mxu2  ;;  %v5454_v8 = vadd.f32 %v2239_v62, %v2048_v40 }
 0x279   : > { %v1395_v28 = vrot.slane %v944_v41, 2  ;;  %v1726_v16 = vpop.f32.mrf.mxu3 }
 0x27a   : > { %v1866_v43 = vpop.f32.mrf.mxu1  ;;  %v5798_v16 = vld [vmem:[#allocation8_spill] sm:$0xff] }
 0x27b   : > { %v1396_v20 = vsel %vm1316_vm3, %v1393_v50, %v1395_v28  ;;  %v2418_v36 = vrot.slane %v1866_v43, 2  ;;  %v4646_v28 = vld [vmem:[%s4857_s13 + $0x54] sm:$0xff]  }
 0x27c   : > { %v2883_v7 = vpop.f32.mrf.mxu0  ;;  %v1460_v3 = vadd.f32 %v1396_v20, %v1203_v53 }
 0x27d   : > { %4071 = vmatmul.msk.bf16.gmra.mxu1 %vm493_vm1, %v4644_v25  ;;  %4101 = vmatmul.msk.bf16.gmra.mxu2 %vm493_vm1, %v4645_v24  ;;  %v3435_v17 = vrot.slane %v2883_v7, 2  ;;  %v5481_v7 = vld [vmem:[%s5789_s3] ss:$0 sm:$0xff] }
 0x27e   : > { %4125 = vmatmul.msk.bf16.gmra.mxu3 %vm493_vm1, %v4645_v24  ;;  %v2049_v29 = vadd.f32 %v1724_v23, %v1460_v3 }
 0x27f   : > { %4149 = vmatmul.msk.bf16.gmra.mxu0 %vm493_vm1, %v4645_v24 }
 0x280   : > { %v2641_v42 = vpop.f32.mrf.mxu2  ;;  %v5464_v31 = vadd.f32 %v2241_v19, %v2049_v29 }
 0x281   : > { %v2754_v44 = vpop.f32.mrf.mxu3 }
 0x282   : > { %v1868_v9 = vpop.f32.mrf.mxu1  ;;  %v3179_v18 = vrot.slane %v2754_v44, 1 }
 0x283   : > { %v2419_v62 = vrot.slane %v1868_v9, 2 }
 0x284   : > { %v2885_v4 = vpop.f32.mrf.mxu0 }
 0x285   : > { %v2420_v1 = vsel %vm1316_vm3, %v2418_v36, %v2419_v62  ;;  %v3436_v2 = vrot.slane %v2885_v4, 2 }
 0x286   : > { %v2530_v50 = vadd.f32 %v2420_v1, %v5118_v38  ;;  %v4647_v38 = vld [vmem:[%s4857_s13 + $0x60] sm:$0xff]  }
 0x287   : > { %v3437_v53 = vsel %vm1316_vm3, %v3435_v17, %v3436_v2 }
 0x288   : > { %v2643_v32 = vpop.f32.mrf.mxu2  ;;  %v3035_v23 = vadd.f32 %v2641_v42, %v2530_v50 }
 0x289   : > { %v2756_v37 = vpop.f32.mrf.mxu3 }
 0x28a   : > { %v3180_v45 = vrot.slane %v2756_v37, 1  ;;  %v1871_v30 = vpop.f32.mrf.mxu1 }
 0x28b   : > { %v2421_v63 = vrot.slane %v1871_v30, 2 }
 0x28c   : > { %v2888_v0 = vpop.f32.mrf.mxu0  ;;  %v3181_v40 = vsel %vm1059_vm2, %v3179_v18, %v3180_v45 }
 0x28d   : > { %v3291_v19 = vadd.f32 %v3181_v40, %v3035_v23  ;;  %v2422_v41 = vsel %vm1316_vm3, %v2419_v62, %v2421_v63  ;;  %4072 = vmatmul.msk.bf16.gmra.mxu1 %vm493_vm1, %v4646_v28  ;;  %4102 = vmatmul.msk.bf16.gmra.mxu2 %vm493_vm1, %v4647_v38  ;;  %v3438_v25 = vrot.slane %v2888_v0, 2 }
 0x28e   : > { %4126 = vmatmul.msk.bf16.gmra.mxu3 %vm493_vm1, %v4647_v38  ;;  %v2531_v59 = vadd.f32 %v2422_v41, %v5798_v16  ;;  %v4649_v41 = vld [vmem:[%s4857_s13 + $0x68] sm:$0xff]  }
 0x28f   : > { %4150 = vmatmul.msk.bf16.gmra.mxu0 %vm493_vm1, %v4647_v38  ;;  %v3547_v20 = vadd.f32 %v3437_v53, %v3291_v19  ;;  %v3439_v4 = vsel %vm1316_vm3, %v3436_v2, %v3438_v25  ;;  %v4648_v19 = vld [vmem:[%s4857_s13 + $0x5c] sm:$0xff]  }
 0x290   : > { %v2646_v43 = vpop.f32.mrf.mxu2  ;;  %v3036_v42 = vadd.f32 %v2643_v32, %v2531_v59 }
 0x291   : > { %v2759_v3 = vpop.f32.mrf.mxu3  ;;  %v3647_v36 = vadd.f32 %v5481_v7, %v3547_v20 }
 0x292   : > { %v3182_v24 = vrot.slane %v2759_v3, 1  ;;  %v1873_v29 = vpop.f32.mrf.mxu1 }
 0x293   : > { %v3679_v37 = vmul.f32 0.1, %v3647_v36  ;;  %v2423_v63 = vrot.slane %v1873_v29, 2 }
 0x294   : > { %v2890_v44 = vpop.f32.mrf.mxu0  ;;  %v3183_v9 = vsel %vm1059_vm2, %v3180_v45, %v3182_v24 }
 0x295   : > { %v3292_v62 = vadd.f32 %v3183_v9, %v3036_v42  ;;  %v3711_v17 = vmax.f32 %v3647_v36, %v3679_v37 }
 0x297   : > { %v3548_v1 = vadd.f32 %v3439_v4, %v3292_v62 }
 0x298   : > { %v2647_v50 = vpop.f32.mrf.mxu2 }
 0x299   : > { %v3648_v18 = vadd.f32 %v5481_v7, %v3548_v1  ;;  %v2761_v30 = vpop.f32.mrf.mxu3 }
 0x29a   : > { %v1876_v23 = vpop.f32.mrf.mxu1  ;;  %v3184_v53 = vrot.slane %v2761_v30, 1 }
 0x29b   : > { %v3680_v32 = vmul.f32 0.1, %v3648_v18  ;;  %v2424_v45 = vrot.slane %v1876_v23, 2 }
 0x29c   : > { %v2893_v0 = vpop.f32.mrf.mxu0 }
 0x29d   : > { %v3712_v40 = vmax.f32 %v3648_v18, %v3680_v32  ;;  %v2425_v2 = vsel %vm1316_vm3, %v2423_v63, %v2424_v45  ;;  %4073 = vmatmul.msk.bf16.gmra.mxu1 %vm493_vm1, %v4648_v19  ;;  %4103 = vmatmul.msk.bf16.gmra.mxu2 %vm493_vm1, %v4649_v41  ;;  %v3441_v29 = vrot.slane %v2893_v0, 2 }
 0x29e   : > { %4127 = vmatmul.msk.bf16.gmra.mxu3 %vm493_vm1, %v4649_v41  ;;  %v2532_v38 = vadd.f32 %v2425_v2, %v5137_v49  ;;  %v3440_v49 = vrot.slane %v2890_v44, 2  ;;  %v4651_v44 = vld [vmem:[%s4857_s13 + $0x70] sm:$0xff]  }
 0x29f   : > { %4151 = vmatmul.msk.bf16.gmra.mxu0 %vm493_vm1, %v4649_v41  ;;  %v4278_v28 = vpack.c.bf16 %v3712_v40, %v3711_v17 }
 0x2a0   : > { %v2650_v16 = vpop.f32.mrf.mxu2  ;;  %v3037_v3 = vadd.f32 %v2647_v50, %v2532_v38  ;;  %v3442_v4 = vsel %vm1316_vm3, %v3440_v49, %v3441_v29 }
 0x2a1   : > { %4279 = vst [vmem:[%s5498_s12] sm:$0xff] %v4278_v28   ;;  %v2764_v59 = vpop.f32.mrf.mxu3 }
 0x2a2   : > { %v3185_v43 = vrot.slane %v2764_v59, 1  ;;  %v1878_v20 = vpop.f32.mrf.mxu1 }
 0x2a3   : > { %v2426_v25 = vrot.slane %v1878_v20, 2 }
 0x2a4   : > { %v2895_v24 = vpop.f32.mrf.mxu0  ;;  %v3186_v42 = vsel %vm1059_vm2, %v3184_v53, %v3185_v43 }
 0x2a5   : > { %v3293_v9 = vadd.f32 %v3186_v42, %v3037_v3  ;;  %v2427_v36 = vsel %vm1316_vm3, %v2424_v45, %v2426_v25  ;;  %v3443_v30 = vrot.slane %v2895_v24, 2  ;;  %v4650_v45 = vld [vmem:[%s4857_s13 + $0x64] sm:$0xff]  }
 0x2a6   : > { %v2533_v62 = vadd.f32 %v2427_v36, %v5148_v61 }
 0x2a7   : > { %v3549_v37 = vadd.f32 %v3442_v4, %v3293_v9  ;;  %v3444_v61 = vsel %vm1316_vm3, %v3441_v29, %v3443_v30 }
 0x2a8   : > { %v2652_v1 = vpop.f32.mrf.mxu2  ;;  %v3038_v32 = vadd.f32 %v2650_v16, %v2533_v62 }
 0x2a9   : > { %v2766_v18 = vpop.f32.mrf.mxu3  ;;  %v3649_v17 = vadd.f32 %v5481_v7, %v3549_v37 }
 0x2aa   : > { %v3187_v50 = vrot.slane %v2766_v18, 1  ;;  %v1881_v23 = vpop.f32.mrf.mxu1 }
 0x2ab   : > { %v3681_v41 = vmul.f32 0.1, %v3649_v17  ;;  %v2428_v53 = vrot.slane %v1881_v23, 2 }
 0x2ac   : > { %v2898_v63 = vpop.f32.mrf.mxu0  ;;  %v3188_v0 = vsel %vm1059_vm2, %v3185_v43, %v3187_v50 }
 0x2ad   : > { %v3294_v40 = vadd.f32 %v3188_v0, %v3038_v32  ;;  %4074 = vmatmul.msk.bf16.gmra.mxu1 %vm493_vm1, %v4650_v45  ;;  %4104 = vmatmul.msk.bf16.gmra.mxu2 %vm493_vm1, %v4651_v44  ;;  %v3713_v3 = vmax.f32 %v3649_v17, %v3681_v41  ;;  %v3445_v30 = vrot.slane %v2898_v63, 2  ;;  %v4652_v17 = vld [vmem:[%s4857_s13 + $0x6c] sm:$0xff]  }
 0x2ae   : > { %4128 = vmatmul.msk.bf16.gmra.mxu3 %vm493_vm1, %v4651_v44 }
 0x2af   : > { %4152 = vmatmul.msk.bf16.gmra.mxu0 %vm493_vm1, %v4651_v44  ;;  %v3550_v2 = vadd.f32 %v3444_v61, %v3294_v40 }
 0x2b0   : > { %v2654_v19 = vpop.f32.mrf.mxu2 }
 0x2b1   : > { %v3650_v28 = vadd.f32 %v5481_v7, %v3550_v2  ;;  %v2769_v38 = vpop.f32.mrf.mxu3 }
 0x2b2   : > { %v1883_v16 = vpop.f32.mrf.mxu1  ;;  %v3189_v49 = vrot.slane %v2769_v38, 1 }
 0x2b3   : > { %v3682_v59 = vmul.f32 0.1, %v3650_v28  ;;  %v2429_v43 = vrot.slane %v1883_v16, 2 }
 0x2b4   : > { %v2900_v20 = vpop.f32.mrf.mxu0 }
 0x2b5   : > { %v3714_v25 = vmax.f32 %v3650_v28, %v3682_v59  ;;  %v2430_v24 = vsel %vm1316_vm3, %v2428_v53, %v2429_v43  ;;  %v3446_v50 = vrot.slane %v2900_v20, 2 }
 0x2b6   : > { %v2534_v42 = vadd.f32 %v2430_v24, %v5163_v33  ;;  %v4653_v33 = vld [vmem:[%s4857_s13 + $0x78] sm:$0xff]  }
 0x2b7   : > { %v4283_v29 = vpack.c.bf16 %v3714_v25, %v3713_v3  ;;  %v3447_v63 = vsel %vm1316_vm3, %v3445_v30, %v3446_v50 }
 0x2b8   : > { %v2656_v9 = vpop.f32.mrf.mxu2  ;;  %v3039_v1 = vadd.f32 %v2654_v19, %v2534_v42 }
 0x2b9   : > { %4489 = vst [vmem:[%s5498_s12 + $0x8] sm:$0xff] %v4283_v29   ;;  %v2771_v36 = vpop.f32.mrf.mxu3 }
 0x2ba   : > { %v3190_v62 = vrot.slane %v2771_v36, 1  ;;  %v1886_v4 = vpop.f32.mrf.mxu1 }
 0x2bb   : > { %v2431_v37 = vrot.slane %v1886_v4, 2 }
 0x2bc   : > { %v2903_v18 = vpop.f32.mrf.mxu0  ;;  %v3191_v23 = vsel %vm1059_vm2, %v3189_v49, %v3190_v62 }
 0x2bd   : > { %v3295_v32 = vadd.f32 %v3191_v23, %v3039_v1  ;;  %v2432_v0 = vsel %vm1316_vm3, %v2429_v43, %v2431_v37  ;;  %4075 = vmatmul.msk.bf16.gmra.mxu1 %vm493_vm1, %v4652_v17  ;;  %4105 = vmatmul.msk.bf16.gmra.mxu2 %vm493_vm1, %v4653_v33  ;;  %v3448_v2 = vrot.slane %v2903_v18, 2  ;;  %v4654_v37 = vld [vmem:[%s4857_s13 + $0x74] sm:$0xff]   ;;  %v4655_v18 = vld [vmem:[%s4857_s13 + $0x80] sm:$0xff]  }
 0x2be   : > { %4129 = vmatmul.msk.bf16.gmra.mxu3 %vm493_vm1, %v4653_v33  ;;  %v2535_v40 = vadd.f32 %v2432_v0, %v5167_v6 }
 0x2bf   : > { %4153 = vmatmul.msk.bf16.gmra.mxu0 %vm493_vm1, %v4653_v33  ;;  %v3551_v44 = vadd.f32 %v3447_v63, %v3295_v32  ;;  %v3449_v43 = vsel %vm1316_vm3, %v3446_v50, %v3448_v2 }
 0x2c0   : > { %v2659_v45 = vpop.f32.mrf.mxu2  ;;  %v3040_v28 = vadd.f32 %v2656_v9, %v2535_v40 }
 0x2c1   : > { %v2774_v61 = vpop.f32.mrf.mxu3  ;;  %v3651_v59 = vadd.f32 %v5481_v7, %v3551_v44 }
 0x2c2   : > { %v3192_v19 = vrot.slane %v2774_v61, 1  ;;  %v1888_v41 = vpop.f32.mrf.mxu1 }
 0x2c3   : > { %v3683_v3 = vmul.f32 0.1, %v3651_v59  ;;  %v2433_v9 = vrot.slane %v1888_v41, 2 }
 0x2c4   : > { %v2905_v38 = vpop.f32.mrf.mxu0  ;;  %v3193_v16 = vsel %vm1059_vm2, %v3190_v62, %v3192_v19 }
 0x2c5   : > { %v3296_v53 = vadd.f32 %v3193_v16, %v3040_v28  ;;  %v3715_v62 = vmax.f32 %v3651_v59, %v3683_v3  ;;  %v3450_v41 = vrot.slane %v2905_v38, 2  ;;  %v4657_v38 = vld [vmem:[%s4857_s13 + $0x88] sm:$0xff]  }
 0x2c7   : > { %v3552_v6 = vadd.f32 %v3449_v43, %v3296_v53 }
 0x2c8   : > { %v2660_v20 = vpop.f32.mrf.mxu2 }
 0x2c9   : > { %v3652_v25 = vadd.f32 %v5481_v7, %v3552_v6  ;;  %v2776_v24 = vpop.f32.mrf.mxu3 }
 0x2ca   : > { %v1891_v29 = vpop.f32.mrf.mxu1  ;;  %v3194_v0 = vrot.slane %v2776_v24, 1 }
 0x2cb   : > { %v3684_v42 = vmul.f32 0.1, %v3652_v25  ;;  %v2434_v36 = vrot.slane %v1891_v29, 2 }
 0x2cc   : > { %v2908_v49 = vpop.f32.mrf.mxu0 }
 0x2cd   : > { %v3716_v4 = vmax.f32 %v3652_v25, %v3684_v42  ;;  %v2435_v1 = vsel %vm1316_vm3, %v2433_v9, %v2434_v36  ;;  %4076 = vmatmul.msk.bf16.gmra.mxu1 %vm493_vm1, %v4654_v37  ;;  %4106 = vmatmul.msk.bf16.gmra.mxu2 %vm493_vm1, %v4655_v18  ;;  %v3451_v44 = vrot.slane %v2908_v49, 2  ;;  %v4656_v9 = vld [vmem:[%s4857_s13 + $0x7c] sm:$0xff]  }
 0x2ce   : > { %4130 = vmatmul.msk.bf16.gmra.mxu3 %vm493_vm1, %v4655_v18  ;;  %v2536_v50 = vadd.f32 %v2435_v1, %v5182_v15 }
 0x2cf   : > { %4154 = vmatmul.msk.bf16.gmra.mxu0 %vm493_vm1, %v4655_v18  ;;  %v4288_v30 = vpack.c.bf16 %v3716_v4, %v3715_v62  ;;  %v3452_v28 = vsel %vm1316_vm3, %v3450_v41, %v3451_v44 }
 0x2d0   : > { %v2663_v23 = vpop.f32.mrf.mxu2  ;;  %v3041_v40 = vadd.f32 %v2660_v20, %v2536_v50 }
 0x2d1   : > { %4490 = vst [vmem:[%s5498_s12 + $0x10] sm:$0xff] %v4288_v30   ;;  %v2779_v32 = vpop.f32.mrf.mxu3 }
 0x2d2   : > { %v3195_v17 = vrot.slane %v2779_v32, 1  ;;  %v1893_v33 = vpop.f32.mrf.mxu1 }
 0x2d3   : > { %v2436_v63 = vrot.slane %v1893_v33, 2 }
 0x2d4   : > { %v2910_v45 = vpop.f32.mrf.mxu0  ;;  %v3196_v61 = vsel %vm1059_vm2, %v3194_v0, %v3195_v17 }
 0x2d5   : > { %v3297_v2 = vadd.f32 %v3196_v61, %v3041_v40  ;;  %v2437_v19 = vsel %vm1316_vm3, %v2434_v36, %v2436_v63  ;;  %v3453_v43 = vrot.slane %v2910_v45, 2 }
 0x2d6   : > { %v2537_v15 = vadd.f32 %v2437_v19, %v5193_v10 }
 0x2d7   : > { %v3553_v59 = vadd.f32 %v3452_v28, %v3297_v2  ;;  %v3454_v10 = vsel %vm1316_vm3, %v3451_v44, %v3453_v43 }
 0x2d8   : > { %v2665_v16 = vpop.f32.mrf.mxu2  ;;  %v3042_v3 = vadd.f32 %v2663_v23, %v2537_v15 }
 0x2d9   : > { %v2781_v53 = vpop.f32.mrf.mxu3  ;;  %v3653_v29 = vadd.f32 %v5481_v7, %v3553_v59 }
 0x2da   : > { %v3197_v6 = vrot.slane %v2781_v53, 1  ;;  %v1896_v20 = vpop.f32.mrf.mxu1 }
 0x2db   : > { %v3685_v62 = vmul.f32 0.1, %v3653_v29  ;;  %v2438_v30 = vrot.slane %v1896_v20, 2 }
 0x2dc   : > { %v2913_v25 = vpop.f32.mrf.mxu0  ;;  %v3198_v24 = vsel %vm1059_vm2, %v3195_v17, %v3197_v6  ;;  %v4658_v6 = vld [vmem:[%s4857_s13 + $0x84] sm:$0xff]  }
 0x2dd   : > { %v3298_v42 = vadd.f32 %v3198_v24, %v3042_v3  ;;  %4077 = vmatmul.msk.bf16.gmra.mxu1 %vm493_vm1, %v4656_v9  ;;  %4107 = vmatmul.msk.bf16.gmra.mxu2 %vm493_vm1, %v4657_v38  ;;  %v3717_v32 = vmax.f32 %v3653_v29, %v3685_v62  ;;  %v3455_v28 = vrot.slane %v2913_v25, 2 }
 0x2de   : > { %4131 = vmatmul.msk.bf16.gmra.mxu3 %vm493_vm1, %v4657_v38 }
 0x2df   : > { %4155 = vmatmul.msk.bf16.gmra.mxu0 %vm493_vm1, %v4657_v38  ;;  %v3554_v36 = vadd.f32 %v3454_v10, %v3298_v42 }
 0x2e0   : > { %v2667_v49 = vpop.f32.mrf.mxu2 }
 0x2e1   : > { %v3654_v4 = vadd.f32 %v5481_v7, %v3554_v36  ;;  %v2784_v1 = vpop.f32.mrf.mxu3 }
 0x2e2   : > { %v1898_v37 = vpop.f32.mrf.mxu1  ;;  %v3199_v44 = vrot.slane %v2784_v1, 1 }
 0x2e3   : > { %v3686_v18 = vmul.f32 0.1, %v3654_v4  ;;  %v2439_v50 = vrot.slane %v1898_v37, 2 }
 0x2e4   : > { %v2915_v23 = vpop.f32.mrf.mxu0 }
 0x2e5   : > { %v3718_v0 = vmax.f32 %v3654_v4, %v3686_v18  ;;  %v2440_v17 = vsel %vm1316_vm3, %v2438_v30, %v2439_v50  ;;  %v3456_v16 = vrot.slane %v2915_v23, 2 }
 0x2e6   : > { %v2538_v40 = vadd.f32 %v2440_v17, %v5208_v22  ;;  %v4659_v22 = vld [vmem:[%s4857_s13 + $0x90] sm:$0xff]  }
 0x2e7   : > { %v4293_v33 = vpack.c.bf16 %v3718_v0, %v3717_v32  ;;  %v3457_v3 = vsel %vm1316_vm3, %v3455_v28, %v3456_v16 }
 0x2e8   : > { %v2669_v63 = vpop.f32.mrf.mxu2  ;;  %v3043_v19 = vadd.f32 %v2667_v49, %v2538_v40 }
 0x2e9   : > { %4491 = vst [vmem:[%s5498_s12 + $0x18] sm:$0xff] %v4293_v33   ;;  %v2786_v45 = vpop.f32.mrf.mxu3 }
 0x2ea   : > { %v3200_v61 = vrot.slane %v2786_v45, 1  ;;  %v1901_v2 = vpop.f32.mrf.mxu1 }
 0x2eb   : > { %v2441_v41 = vrot.slane %v1901_v2, 2 }
 0x2ec   : > { %v2918_v15 = vpop.f32.mrf.mxu0  ;;  %v3201_v59 = vsel %vm1059_vm2, %v3199_v44, %v3200_v61  ;;  %v4660_v44 = vld [vmem:[%s4857_s13 + $0x8c] sm:$0xff]  }
 0x2ed   : > { %v3299_v53 = vadd.f32 %v3201_v59, %v3043_v19  ;;  %v2442_v43 = vsel %vm1316_vm3, %v2439_v50, %v2441_v41  ;;  %4078 = vmatmul.msk.bf16.gmra.mxu1 %vm493_vm1, %v4658_v6  ;;  %4108 = vmatmul.msk.bf16.gmra.mxu2 %vm493_vm1, %v4659_v22  ;;  %v3458_v42 = vrot.slane %v2918_v15, 2 }
 0x2ee   : > { %4132 = vmatmul.msk.bf16.gmra.mxu3 %vm493_vm1, %v4659_v22  ;;  %v2539_v20 = vadd.f32 %v2442_v43, %v5212_v60 }
 0x2ef   : > { %4156 = vmatmul.msk.bf16.gmra.mxu0 %vm493_vm1, %v4659_v22  ;;  %v3555_v24 = vadd.f32 %v3457_v3, %v3299_v53  ;;  %v3459_v1 = vsel %vm1316_vm3, %v3456_v16, %v3458_v42 }
 0x2f0   : > { %v2672_v25 = vpop.f32.mrf.mxu2  ;;  %v3044_v10 = vadd.f32 %v2669_v63, %v2539_v20 }
 0x2f1   : > { %v2789_v29 = vpop.f32.mrf.mxu3  ;;  %v3655_v62 = vadd.f32 %v5481_v7, %v3555_v24 }
 0x2f2   : > { %v3202_v9 = vrot.slane %v2789_v29, 1  ;;  %v1903_v38 = vpop.f32.mrf.mxu1 }
 0x2f3   : > { %v3687_v18 = vmul.f32 0.1, %v3655_v62  ;;  %v2443_v0 = vrot.slane %v1903_v38, 2 }
 0x2f4   : > { %v2920_v36 = vpop.f32.mrf.mxu0  ;;  %v3203_v49 = vsel %vm1059_vm2, %v3200_v61, %v3202_v9  ;;  %v4661_v61 = vld [vmem:[%s4857_s13 + $0x98] sm:$0xff]  }
 0x2f5   : > { %v3300_v4 = vadd.f32 %v3203_v49, %v3044_v10  ;;  %v3719_v40 = vmax.f32 %v3655_v62, %v3687_v18  ;;  %v3460_v24 = vrot.slane %v2920_v36, 2  ;;  %v4663_v36 = vld [vmem:[%s4857_s13 + $0xa0] sm:$0xff]  }
 0x2f7   : > { %v3556_v60 = vadd.f32 %v3459_v1, %v3300_v4 }
 0x2f8   : > { %v2673_v37 = vpop.f32.mrf.mxu2 }
 0x2f9   : > { %v3656_v30 = vadd.f32 %v5481_v7, %v3556_v60  ;;  %v2791_v50 = vpop.f32.mrf.mxu3 }
 0x2fa   : > { %v1906_v23 = vpop.f32.mrf.mxu1  ;;  %v3204_v28 = vrot.slane %v2791_v50, 1 }
 0x2fb   : > { %v3688_v32 = vmul.f32 0.1, %v3656_v30  ;;  %v2444_v17 = vrot.slane %v1906_v23, 2 }
 0x2fc   : > { %v2923_v33 = vpop.f32.mrf.mxu0 }
 0x2fd   : > { %v3720_v63 = vmax.f32 %v3656_v30, %v3688_v32  ;;  %v2445_v45 = vsel %vm1316_vm3, %v2443_v0, %v2444_v17  ;;  %4079 = vmatmul.msk.bf16.gmra.mxu1 %vm493_vm1, %v4660_v44  ;;  %4109 = vmatmul.msk.bf16.gmra.mxu2 %vm493_vm1, %v4661_v61  ;;  %v3461_v22 = vrot.slane %v2923_v33, 2  ;;  %v4662_v30 = vld [vmem:[%s4857_s13 + $0x94] sm:$0xff]  }
 0x2fe   : > { %4133 = vmatmul.msk.bf16.gmra.mxu3 %vm493_vm1, %v4661_v61  ;;  %v2540_v19 = vadd.f32 %v2445_v45, %v5227_v34 }
 0x2ff   : > { %4157 = vmatmul.msk.bf16.gmra.mxu0 %vm493_vm1, %v4661_v61  ;;  %v4298_v2 = vpack.c.bf16 %v3720_v63, %v3719_v40  ;;  %v3462_v29 = vsel %vm1316_vm3, %v3460_v24, %v3461_v22 }
 0x300   : > { %v2676_v41 = vpop.f32.mrf.mxu2  ;;  %v3045_v53 = vadd.f32 %v2673_v37, %v2540_v19 }
 0x301   : > { %4492 = vst [vmem:[%s5498_s12 + $0x20] sm:$0xff] %v4298_v2   ;;  %v2794_v15 = vpop.f32.mrf.mxu3 }
 0x302   : > { %v3205_v16 = vrot.slane %v2794_v15, 1  ;;  %v1908_v59 = vpop.f32.mrf.mxu1 }
 0x303   : > { %v2446_v43 = vrot.slane %v1908_v59, 2 }
 0x304   : > { %v2925_v6 = vpop.f32.mrf.mxu0  ;;  %v3206_v20 = vsel %vm1059_vm2, %v3204_v28, %v3205_v16 }
 0x305   : > { %v3301_v3 = vadd.f32 %v3206_v20, %v3045_v53  ;;  %v2447_v25 = vsel %vm1316_vm3, %v2444_v17, %v2446_v43  ;;  %v3463_v10 = vrot.slane %v2925_v6, 2 }
 0x306   : > { %v2541_v34 = vadd.f32 %v2447_v25, %v5238_v27 }
 0x307   : > { %v3557_v9 = vadd.f32 %v3462_v29, %v3301_v3  ;;  %v3464_v27 = vsel %vm1316_vm3, %v3461_v22, %v3463_v10 }
 0x308   : > { %v2678_v42 = vpop.f32.mrf.mxu2  ;;  %v3046_v4 = vadd.f32 %v2676_v41, %v2541_v34 }
 0x309   : > { %v2796_v38 = vpop.f32.mrf.mxu3  ;;  %v3657_v37 = vadd.f32 %v5481_v7, %v3557_v9  ;;  %v4664_v42 = vld [vmem:[%s4857_s13 + $0x9c] sm:$0xff]  }
 0x30a   : > { %v3207_v49 = vrot.slane %v2796_v38, 1  ;;  %v1911_v62 = vpop.f32.mrf.mxu1 }
 0x30b   : > { %v3689_v32 = vmul.f32 0.1, %v3657_v37  ;;  %v2448_v63 = vrot.slane %v1911_v62, 2 }
 0x30c   : > { %v2928_v1 = vpop.f32.mrf.mxu0  ;;  %v3208_v60 = vsel %vm1059_vm2, %v3205_v16, %v3207_v49 }
 0x30d   : > { %v3302_v18 = vadd.f32 %v3208_v60, %v3046_v4  ;;  %4080 = vmatmul.msk.bf16.gmra.mxu1 %vm493_vm1, %v4662_v30  ;;  %4110 = vmatmul.msk.bf16.gmra.mxu2 %vm493_vm1, %v4663_v36  ;;  %v3721_v61 = vmax.f32 %v3657_v37, %v3689_v32  ;;  %v3465_v3 = vrot.slane %v2928_v1, 2 }
 0x30e   : > { %4134 = vmatmul.msk.bf16.gmra.mxu3 %vm493_vm1, %v4663_v36 }
 0x30f   : > { %4158 = vmatmul.msk.bf16.gmra.mxu0 %vm493_vm1, %v4663_v36  ;;  %v3558_v50 = vadd.f32 %v3464_v27, %v3302_v18 }
 0x310   : > { %v2680_v23 = vpop.f32.mrf.mxu2 }
 0x311   : > { %v3658_v0 = vadd.f32 %v5481_v7, %v3558_v50  ;;  %v2799_v17 = vpop.f32.mrf.mxu3 }
 0x312   : > { %v1913_v33 = vpop.f32.mrf.mxu1  ;;  %v3209_v59 = vrot.slane %v2799_v17, 1 }
 0x313   : > { %v3690_v40 = vmul.f32 0.1, %v3658_v0  ;;  %v2449_v45 = vrot.slane %v1913_v33, 2 }
 0x314   : > { %v2930_v44 = vpop.f32.mrf.mxu0 }
 0x315   : > { %v3722_v2 = vmax.f32 %v3658_v0, %v3690_v40  ;;  %v2450_v19 = vsel %vm1316_vm3, %v2448_v63, %v2449_v45  ;;  %v3466_v25 = vrot.slane %v2930_v44, 2 }
 0x316   : > { %v2542_v15 = vadd.f32 %v2450_v19, %v5253_v58  ;;  %v4665_v58 = vld [vmem:[%s4857_s13 + $0xa8] sm:$0xff]  }
 0x317   : > { %v4303_v41 = vpack.c.bf16 %v3722_v2, %v3721_v61  ;;  %v3467_v38 = vsel %vm1316_vm3, %v3465_v3, %v3466_v25 }
 0x318   : > { %v2682_v28 = vpop.f32.mrf.mxu2  ;;  %v3047_v6 = vadd.f32 %v2680_v23, %v2542_v15  ;;  %v4667_v15 = vld [vmem:[%s4857_s13 + $0xb0] sm:$0xff]  }
 0x319   : > { %4493 = vst [vmem:[%s5498_s12 + $0x28] sm:$0xff] %v4303_v41   ;;  %v2801_v16 = vpop.f32.mrf.mxu3  ;;  %v4666_v41 = vld [vmem:[%s4857_s13 + $0xa4] sm:$0xff]  }
 0x31a   : > { %v3210_v53 = vrot.slane %v2801_v16, 1  ;;  %v1916_v43 = vpop.f32.mrf.mxu1 }
 0x31b   : > { %v2451_v22 = vrot.slane %v1916_v43, 2 }
 0x31c   : > { %v2933_v20 = vpop.f32.mrf.mxu0  ;;  %v3211_v24 = vsel %vm1059_vm2, %v3209_v59, %v3210_v53 }
 0x31d   : > { %v3303_v34 = vadd.f32 %v3211_v24, %v3047_v6  ;;  %v2452_v29 = vsel %vm1316_vm3, %v2449_v45, %v2451_v22  ;;  %4081 = vmatmul.msk.bf16.gmra.mxu1 %vm493_vm1, %v4664_v42  ;;  %4111 = vmatmul.msk.bf16.gmra.mxu2 %vm493_vm1, %v4665_v58  ;;  %v3468_v4 = vrot.slane %v2933_v20, 2 }
 0x31e   : > { %4135 = vmatmul.msk.bf16.gmra.mxu3 %vm493_vm1, %v4665_v58  ;;  %v2543_v9 = vadd.f32 %v2452_v29, %v5257_v26 }
 0x31f   : > { %4159 = vmatmul.msk.bf16.gmra.mxu0 %vm493_vm1, %v4665_v58  ;;  %v3559_v49 = vadd.f32 %v3467_v38, %v3303_v34  ;;  %v3469_v50 = vsel %vm1316_vm3, %v3466_v25, %v3468_v4 }
 0x320   : > { %v2685_v10 = vpop.f32.mrf.mxu2  ;;  %v3048_v37 = vadd.f32 %v2682_v28, %v2543_v9 }
 0x321   : > { %v2804_v62 = vpop.f32.mrf.mxu3  ;;  %v3659_v36 = vadd.f32 %v5481_v7, %v3559_v49 }
 0x322   : > { %v3212_v1 = vrot.slane %v2804_v62, 1  ;;  %v1918_v60 = vpop.f32.mrf.mxu1 }
 0x323   : > { %v3691_v32 = vmul.f32 0.1, %v3659_v36  ;;  %v2453_v63 = vrot.slane %v1918_v60, 2 }
 0x324   : > { %v2935_v18 = vpop.f32.mrf.mxu0  ;;  %v3213_v30 = vsel %vm1059_vm2, %v3210_v53, %v3212_v1 }
 0x325   : > { %v3304_v27 = vadd.f32 %v3213_v30, %v3048_v37  ;;  %v3723_v61 = vmax.f32 %v3659_v36, %v3691_v32  ;;  %v3470_v58 = vrot.slane %v2935_v18, 2  ;;  %v4669_v18 = vld [vmem:[%s4857_s13 + $0xb8] sm:$0xff]  }
 0x327   : > { %v3560_v26 = vadd.f32 %v3469_v50, %v3304_v27  ;;  %v4668_v50 = vld [vmem:[%s4857_s13 + $0xac] sm:$0xff]  }
 0x328   : > { %v2686_v23 = vpop.f32.mrf.mxu2 }
 0x329   : > { %v3660_v0 = vadd.f32 %v5481_v7, %v3560_v26  ;;  %v2806_v17 = vpop.f32.mrf.mxu3 }
 0x32a   : > { %v1921_v33 = vpop.f32.mrf.mxu1  ;;  %v3214_v43 = vrot.slane %v2806_v17, 1 }
 0x32b   : > { %v3692_v40 = vmul.f32 0.1, %v3660_v0  ;;  %v2454_v45 = vrot.slane %v1921_v33, 2 }
 0x32c   : > { %v2938_v44 = vpop.f32.mrf.mxu0 }
 0x32d   : > { %v3724_v2 = vmax.f32 %v3660_v0, %v3692_v40  ;;  %v2455_v19 = vsel %vm1316_vm3, %v2453_v63, %v2454_v45  ;;  %4082 = vmatmul.msk.bf16.gmra.mxu1 %vm493_vm1, %v4666_v41  ;;  %4112 = vmatmul.msk.bf16.gmra.mxu2 %vm493_vm1, %v4667_v15  ;;  %v3471_v24 = vrot.slane %v2938_v44, 2 }
 0x32e   : > { %4136 = vmatmul.msk.bf16.gmra.mxu3 %vm493_vm1, %v4667_v15  ;;  %v2544_v16 = vadd.f32 %v2455_v19, %v5272_v39 }
 0x32f   : > { %4160 = vmatmul.msk.bf16.gmra.mxu0 %vm493_vm1, %v4667_v15  ;;  %v4308_v28 = vpack.c.bf16 %v3724_v2, %v3723_v61  ;;  %v3472_v9 = vsel %vm1316_vm3, %v3470_v58, %v3471_v24  ;;  %v4670_v58 = vld [vmem:[%s4857_s13 + $0xb4] sm:$0xff]  }
 0x330   : > { %v2689_v59 = vpop.f32.mrf.mxu2  ;;  %v3049_v20 = vadd.f32 %v2686_v23, %v2544_v16 }
 0x331   : > { %4494 = vst [vmem:[%s5498_s12 + $0x30] sm:$0xff] %v4308_v28   ;;  %v2809_v53 = vpop.f32.mrf.mxu3 }
 0x332   : > { %v3215_v6 = vrot.slane %v2809_v53, 1  ;;  %v1923_v22 = vpop.f32.mrf.mxu1 }
 0x333   : > { %v2456_v3 = vrot.slane %v1923_v22, 2 }
 0x334   : > { %v2940_v25 = vpop.f32.mrf.mxu0  ;;  %v3216_v34 = vsel %vm1059_vm2, %v3214_v43, %v3215_v6 }
 0x335   : > { %v3305_v29 = vadd.f32 %v3216_v34, %v3049_v20  ;;  %v2457_v42 = vsel %vm1316_vm3, %v2454_v45, %v2456_v3  ;;  %v3473_v62 = vrot.slane %v2940_v25, 2 }
 0x336   : > { %v2545_v39 = vadd.f32 %v2457_v42, %v5283_v46 }
 0x337   : > { %v3561_v10 = vadd.f32 %v3472_v9, %v3305_v29  ;;  %v3474_v46 = vsel %vm1316_vm3, %v3471_v24, %v3473_v62 }
 0x338   : > { %v2691_v38 = vpop.f32.mrf.mxu2  ;;  %v3050_v60 = vadd.f32 %v2689_v59, %v2545_v39 }
 0x339   : > { %v2811_v49 = vpop.f32.mrf.mxu3  ;;  %v3661_v36 = vadd.f32 %v5481_v7, %v3561_v10 }
 0x33a   : > { %v3217_v4 = vrot.slane %v2811_v49, 1  ;;  %v1926_v1 = vpop.f32.mrf.mxu1 }
 0x33b   : > { %v3693_v32 = vmul.f32 0.1, %v3661_v36  ;;  %v2458_v63 = vrot.slane %v1926_v1, 2 }
 0x33c   : > { %v2943_v37 = vpop.f32.mrf.mxu0  ;;  %v3218_v30 = vsel %vm1059_vm2, %v3215_v6, %v3217_v4  ;;  %v4268_v6 = vld [vmem:[%s5307_s7] sm:$0xff]  }
 0x33d   : > { %v3306_v27 = vadd.f32 %v3218_v30, %v3050_v60  ;;  %4083 = vmatmul.msk.bf16.gmra.mxu1 %vm493_vm1, %v4668_v50  ;;  %4113 = vmatmul.msk.bf16.gmra.mxu2 %vm493_vm1, %v4669_v18  ;;  %v3725_v61 = vmax.f32 %v3661_v36, %v3693_v32  ;;  %v3475_v25 = vrot.slane %v2943_v37, 2  ;;  %v4378_v32 = vld [vmem:[%s5307_s7 + $0x8] sm:$0xff]  }
 0x33e   : > { %4137 = vmatmul.msk.bf16.gmra.mxu3 %vm493_vm1, %v4669_v18 }
 0x33f   : > { %4161 = vmatmul.msk.bf16.gmra.mxu0 %vm493_vm1, %v4669_v18  ;;  %v3562_v26 = vadd.f32 %v3474_v46, %v3306_v27 }
 0x340   : > { %v2693_v23 = vpop.f32.mrf.mxu2 }
 0x341   : > { %v3662_v0 = vadd.f32 %v5481_v7, %v3562_v26  ;;  %v2814_v17 = vpop.f32.mrf.mxu3 }
 0x342   : > { %v1928_v33 = vpop.f32.mrf.mxu1  ;;  %v3219_v59 = vrot.slane %v2814_v17, 1 }
 0x343   : > { %v3694_v40 = vmul.f32 0.1, %v3662_v0  ;;  %v2459_v45 = vrot.slane %v1928_v33, 2 }
 0x344   : > { %v2945_v44 = vpop.f32.mrf.mxu0 }
 0x345   : > { %v3726_v2 = vmax.f32 %v3662_v0, %v3694_v40  ;;  %v2460_v19 = vsel %vm1316_vm3, %v2458_v63, %v2459_v45  ;;  %v3476_v24 = vrot.slane %v2945_v44, 2 }
 0x346   : > { %v2546_v15 = vadd.f32 %v2460_v19, %v5298_v5 }
 0x347   : > { %v4313_v41 = vpack.c.bf16 %v3726_v2, %v3725_v61  ;;  %v3477_v39 = vsel %vm1316_vm3, %v3475_v25, %v3476_v24 }
 0x348   : > { %v2695_v28 = vpop.f32.mrf.mxu2  ;;  %v3051_v22 = vadd.f32 %v2693_v23, %v2546_v15 }
 0x349   : > { %4495 = vst [vmem:[%s5498_s12 + $0x38] sm:$0xff] %v4313_v41   ;;  %v2816_v16 = vpop.f32.mrf.mxu3 }
 0x34a   : > { %v3220_v53 = vrot.slane %v2816_v16, 1  ;;  %v1931_v43 = vpop.f32.mrf.mxu1 }
 0x34b   : > { %v2461_v20 = vrot.slane %v1931_v43, 2 }
 0x34c   : > { %v2948_v3 = vpop.f32.mrf.mxu0  ;;  %v3221_v34 = vsel %vm1059_vm2, %v3219_v59, %v3220_v53 }
 0x34d   : > { %v3307_v29 = vadd.f32 %v3221_v34, %v3051_v22  ;;  %v2462_v42 = vsel %vm1316_vm3, %v2459_v45, %v2461_v20  ;;  %4084 = vmatmul.msk.bf16.gmra.mxu1 %vm493_vm1, %v4670_v58  ;;  %4114 = vmatmul.msk.bf16.gmra.mxu2 %vm493_vm1, %v4268_v6  ;;  %v3478_v49 = vrot.slane %v2948_v3, 2 }
 0x34e   : > { %4138 = vmatmul.msk.bf16.gmra.mxu3 %vm493_vm1, %v4268_v6  ;;  %v2547_v5 = vadd.f32 %v2462_v42, %v5311_v48  ;;  %v4173_v42 = vld [vmem:[%s5307_s7 + $0x10] sm:$0xff] }
 0x34f   : > { %4162 = vmatmul.msk.bf16.gmra.mxu0 %vm493_vm1, %v4268_v6  ;;  %v3563_v38 = vadd.f32 %v3477_v39, %v3307_v29  ;;  %v3479_v27 = vsel %vm1316_vm3, %v3476_v24, %v3478_v49 }
 0x350   : > { %v2698_v9 = vpop.f32.mrf.mxu2  ;;  %v3052_v1 = vadd.f32 %v2695_v28, %v2547_v5 }
 0x351   : > { %v2819_v10 = vpop.f32.mrf.mxu3  ;;  %v3663_v30 = vadd.f32 %v5481_v7, %v3563_v38 }
 0x352   : > { %v3222_v62 = vrot.slane %v2819_v10, 1  ;;  %v1933_v4 = vpop.f32.mrf.mxu1 }
 0x353   : > { %v3695_v18 = vmul.f32 0.1, %v3663_v30  ;;  %v2463_v17 = vrot.slane %v1933_v4, 2  ;;  %v4671_v4 = vld [vmem:[%s5307_s7 + $0x4] sm:$0xff]  }
 0x354   : > { %v2950_v60 = vpop.f32.mrf.mxu0  ;;  %v3223_v37 = vsel %vm1059_vm2, %v3220_v53, %v3222_v62 }
 0x355   : > { %v3308_v36 = vadd.f32 %v3223_v37, %v3052_v1  ;;  %v3727_v63 = vmax.f32 %v3663_v30, %v3695_v18  ;;  %v3480_v3 = vrot.slane %v2950_v60, 2 }
 0x357   : > { %v3564_v50 = vadd.f32 %v3479_v27, %v3308_v36 }
 0x358   : > { %v2699_v48 = vpop.f32.mrf.mxu2 }
 0x359   : > { %v3664_v46 = vadd.f32 %v5481_v7, %v3564_v50  ;;  %v2821_v26 = vpop.f32.mrf.mxu3 }
 0x35a   : > { %v1936_v23 = vpop.f32.mrf.mxu1  ;;  %v3224_v15 = vrot.slane %v2821_v26, 1 }
 0x35b   : > { %v3696_v0 = vmul.f32 0.1, %v3664_v46  ;;  %v2464_v33 = vrot.slane %v1936_v23, 2 }
 0x35c   : > { %v2953_v40 = vpop.f32.mrf.mxu0 }
 0x35d   : > { %v3728_v45 = vmax.f32 %v3664_v46, %v3696_v0  ;;  %v2465_v44 = vsel %vm1316_vm3, %v2463_v17, %v2464_v33  ;;  %4085 = vmatmul.msk.bf16.gmra.mxu1 %vm493_vm1, %v5313_v54  ;;  %4115 = vmatmul.msk.bf16.gmra.mxu2 %vm493_vm1, %v4378_v32  ;;  %v3481_v54 = vrot.slane %v2953_v40, 2 }
 0x35e   : > { %4139 = vmatmul.msk.bf16.gmra.mxu3 %vm493_vm1, %v4378_v32  ;;  %v2548_v2 = vadd.f32 %v2465_v44, %v5328_v47 }
 0x35f   : > { %4163 = vmatmul.msk.bf16.gmra.mxu0 %vm493_vm1, %v4378_v32  ;;  %v4318_v61 = vpack.c.bf16 %v3728_v45, %v3727_v63  ;;  %v3482_v25 = vsel %vm1316_vm3, %v3480_v3, %v3481_v54 }
 0x360   : > { %v2702_v19 = vpop.f32.mrf.mxu2  ;;  %v3053_v59 = vadd.f32 %v2699_v48, %v2548_v2 }
 0x361   : > { %4496 = vst [vmem:[%s5498_s12 + $0x40] sm:$0xff] %v4318_v61   ;;  %v2824_v41 = vpop.f32.mrf.mxu3 }
 0x362   : > { %v3225_v28 = vrot.slane %v2824_v41, 1  ;;  %v1938_v16 = vpop.f32.mrf.mxu1 }
 0x363   : > { %v2466_v53 = vrot.slane %v1938_v16, 2 }
 0x364   : > { %v2955_v43 = vpop.f32.mrf.mxu0  ;;  %v3226_v6 = vsel %vm1059_vm2, %v3224_v15, %v3225_v28 }
 0x365   : > { %v3309_v22 = vadd.f32 %v3226_v6, %v3053_v59  ;;  %v2467_v20 = vsel %vm1316_vm3, %v2464_v33, %v2466_v53  ;;  %v3483_v58 = vrot.slane %v2955_v43, 2 }
 0x366   : > { %v2549_v47 = vadd.f32 %v2467_v20, %v5338_v55 }
 0x367   : > { %v3565_v34 = vadd.f32 %v3482_v25, %v3309_v22  ;;  %v3484_v55 = vsel %vm1316_vm3, %v3481_v54, %v3483_v58 }
 0x368   : > { %v2704_v24 = vpop.f32.mrf.mxu2  ;;  %v3054_v9 = vadd.f32 %v2702_v19, %v2549_v47 }
 0x369   : > { %v2826_v29 = vpop.f32.mrf.mxu3  ;;  %v3665_v49 = vadd.f32 %v5481_v7, %v3565_v34 }
 0x36a   : > { %v3227_v5 = vrot.slane %v2826_v29, 1  ;;  %v1941_v39 = vpop.f32.mrf.mxu1 }
 0x36b   : > { %v3697_v37 = vmul.f32 0.1, %v3665_v49  ;;  %v2468_v48 = vrot.slane %v1941_v39, 2 }
 0x36c   : > { %v2958_v38 = vpop.f32.mrf.mxu0  ;;  %v3228_v10 = vsel %vm1059_vm2, %v3225_v28, %v3227_v5 }
 0x36d   : > { %v3310_v62 = vadd.f32 %v3228_v10, %v3054_v9  ;;  %4086 = vmatmul.msk.bf16.gmra.mxu1 %vm493_vm1, %v4671_v4  ;;  %4116 = vmatmul.msk.bf16.gmra.mxu2 %vm493_vm1, %v4173_v42  ;;  %v3729_v26 = vmax.f32 %v3665_v49, %v3697_v37  ;;  %v3485_v41 = vrot.slane %v2958_v38, 2 }
 0x36e   : > { %4140 = vmatmul.msk.bf16.gmra.mxu3 %vm493_vm1, %v4173_v42 }
 0x36f   : > { %4164 = vmatmul.msk.bf16.gmra.mxu0 %vm493_vm1, %v4173_v42  ;;  %v3566_v1 = vadd.f32 %v3484_v55, %v3310_v62 }
 0x370   : > { %v2706_v60 = vpop.f32.mrf.mxu2 }
 0x371   : > { %v3666_v30 = vadd.f32 %v5481_v7, %v3566_v1  ;;  %v2829_v36 = vpop.f32.mrf.mxu3 }
 0x372   : > { %v1943_v27 = vpop.f32.mrf.mxu1  ;;  %v3229_v63 = vrot.slane %v2829_v36, 1 }
 0x373   : > { %v3698_v50 = vmul.f32 0.1, %v3666_v30  ;;  %v2469_v18 = vrot.slane %v1943_v27, 2 }
 0x374   : > { %v2960_v46 = vpop.f32.mrf.mxu0 }
 0x375   : > { %v3730_v23 = vmax.f32 %v3666_v30, %v3698_v50  ;;  %v2470_v32 = vsel %vm1316_vm3, %v2468_v48, %v2469_v18  ;;  %v3486_v15 = vrot.slane %v2960_v46, 2 }
 0x376   : > { %v2550_v17 = vadd.f32 %v2470_v32, %v5352_v11 }
 0x377   : > { %v4323_v0 = vpack.c.bf16 %v3730_v23, %v3729_v26  ;;  %v3487_v11 = vsel %vm1316_vm3, %v3485_v41, %v3486_v15 }
 0x378   : > { %v2708_v33 = vpop.f32.mrf.mxu2  ;;  %v3055_v61 = vadd.f32 %v2706_v60, %v2550_v17 }
 0x379   : > { %4497 = vst [vmem:[%s5498_s12 + $0x48] sm:$0xff] %v4323_v0   ;;  %v2831_v40 = vpop.f32.mrf.mxu3 }
 0x37a   : > { %v3230_v45 = vrot.slane %v2831_v40, 1  ;;  %v1946_v44 = vpop.f32.mrf.mxu1 }
 0x37b   : > { %v2471_v2 = vrot.slane %v1946_v44, 2 }
 0x37c   : > { %v2963_v19 = vpop.f32.mrf.mxu0  ;;  %v3231_v28 = vsel %vm1059_vm2, %v3229_v63, %v3230_v45 }
 0x37d   : > { %v3311_v16 = vadd.f32 %v3231_v28, %v3055_v61  ;;  %v2472_v59 = vsel %vm1316_vm3, %v2469_v18, %v2471_v2  ;;  %v3488_v22 = vrot.slane %v2963_v19, 2 }
 0x37e   : > { %v2551_v53 = vadd.f32 %v2472_v59, %v5356_v21 }
 0x37f   : > { %v3567_v54 = vadd.f32 %v3487_v11, %v3311_v16  ;;  %v3489_v42 = vsel %vm1316_vm3, %v3486_v15, %v3488_v22  ;;  %v5697_v16 = vld [vmem:[%s5789_s3] ss:$0 sm:$0xff] }
 0x380   : > { %v2711_v43 = vpop.f32.mrf.mxu2  ;;  %v3056_v47 = vadd.f32 %v2708_v33, %v2551_v53 }
 0x381   : > { %v2834_v6 = vpop.f32.mrf.mxu3  ;;  %v3667_v34 = vadd.f32 %v5481_v7, %v3567_v54 }
 0x382   : > { %v3232_v20 = vrot.slane %v2834_v6, 1  ;;  %v1948_v3 = vpop.f32.mrf.mxu1 }
 0x383   : > { %v3699_v5 = vmul.f32 0.1, %v3667_v34  ;;  %v2473_v49 = vrot.slane %v1948_v3, 2 }
 0x384   : > { %v2965_v25 = vpop.f32.mrf.mxu0  ;;  %v3233_v24 = vsel %vm1059_vm2, %v3230_v45, %v3232_v20 }
 0x385   : > { %v3312_v29 = vadd.f32 %v3233_v24, %v3056_v47  ;;  %v3731_v55 = vmax.f32 %v3667_v34, %v3699_v5  ;;  %v3490_v33 = vrot.slane %v2965_v25, 2 }
 0x387   : > { %v3568_v58 = vadd.f32 %v3489_v42, %v3312_v29 }
 0x388   : > { %v2712_v21 = vpop.f32.mrf.mxu2 }
 0x389   : > { %v3668_v39 = vadd.f32 %v5481_v7, %v3568_v58  ;;  %v2836_v9 = vpop.f32.mrf.mxu3 }
 0x38a   : > { %v1951_v38 = vpop.f32.mrf.mxu1  ;;  %v3234_v50 = vrot.slane %v2836_v9, 1 }
 0x38b   : > { %v3700_v10 = vmul.f32 0.1, %v3668_v39  ;;  %v2474_v62 = vrot.slane %v1951_v38, 2 }
 0x38c   : > { %v2968_v4 = vpop.f32.mrf.mxu0 }
 0x38d   : > { %v3732_v1 = vmax.f32 %v3668_v39, %v3700_v10  ;;  %v2475_v60 = vsel %vm1316_vm3, %v2473_v49, %v2474_v62  ;;  %v3491_v23 = vrot.slane %v2968_v4, 2 }
 0x38e   : > { %v2552_v30 = vadd.f32 %v2475_v60, %v5370_v13 }
 0x38f   : > { %v4328_v37 = vpack.c.bf16 %v3732_v1, %v3731_v55  ;;  %v3492_v13 = vsel %vm1316_vm3, %v3490_v33, %v3491_v23 }
 0x390   : > { %v2715_v36 = vpop.f32.mrf.mxu2  ;;  %v3057_v7 = vadd.f32 %v2712_v21, %v2552_v30 }
 0x391   : > { %4498 = vst [vmem:[%s5498_s12 + $0x50] sm:$0xff] %v4328_v37   ;;  %v2839_v27 = vpop.f32.mrf.mxu3 }
 0x392   : > { %v3235_v48 = vrot.slane %v2839_v27, 1  ;;  %v1953_v18 = vpop.f32.mrf.mxu1 }
 0x393   : > { %v2476_v46 = vrot.slane %v1953_v18, 2 }
 0x394   : > { %v2970_v26 = vpop.f32.mrf.mxu0  ;;  %v3236_v32 = vsel %vm1059_vm2, %v3234_v50, %v3235_v48 }
 0x395   : > { %v3313_v0 = vadd.f32 %v3236_v32, %v3057_v7  ;;  %v2477_v17 = vsel %vm1316_vm3, %v2474_v62, %v2476_v46  ;;  %v3493_v61 = vrot.slane %v2970_v26, 2 }
 0x396   : > { %v2553_v40 = vadd.f32 %v2477_v17, %v5380_v51 }
 0x397   : > { %v3569_v45 = vadd.f32 %v3492_v13, %v3313_v0  ;;  %v3494_v53 = vsel %vm1316_vm3, %v3491_v23, %v3493_v61 }
 0x398   : > { %v2717_v63 = vpop.f32.mrf.mxu2  ;;  %v3058_v41 = vadd.f32 %v2715_v36, %v2553_v40 }
 0x399   : > { %v2841_v44 = vpop.f32.mrf.mxu3  ;;  %v3669_v59 = vadd.f32 %v5697_v16, %v3569_v45 }
 0x39a   : > { %v3237_v2 = vrot.slane %v2841_v44, 1  ;;  %v1956_v19 = vpop.f32.mrf.mxu1 }
 0x39b   : > { %v3701_v54 = vmul.f32 0.1, %v3669_v59  ;;  %v2478_v47 = vrot.slane %v1956_v19, 2 }
 0x39c   : > { %v2973_v15 = vpop.f32.mrf.mxu0  ;;  %v3238_v28 = vsel %vm1059_vm2, %v3235_v48, %v3237_v2 }
 0x39d   : > { %v3314_v51 = vadd.f32 %v3238_v28, %v3058_v41  ;;  %v3733_v34 = vmax.f32 %v3669_v59, %v3701_v54  ;;  %v3495_v55 = vrot.slane %v2973_v15, 2 }
 0x39f   : > { %v3570_v11 = vadd.f32 %v3494_v53, %v3314_v51 }
 0x3a0   : > { %v2719_v43 = vpop.f32.mrf.mxu2 }
 0x3a1   : > { %v3670_v6 = vadd.f32 %v5697_v16, %v3570_v11  ;;  %v2844_v22 = vpop.f32.mrf.mxu3 }
 0x3a2   : > { %v1958_v20 = vpop.f32.mrf.mxu1  ;;  %v3239_v9 = vrot.slane %v2844_v22, 1 }
 0x3a3   : > { %v3702_v3 = vmul.f32 0.1, %v3670_v6  ;;  %v2479_v25 = vrot.slane %v1958_v20, 2 }
 0x3a4   : > { %v2975_v24 = vpop.f32.mrf.mxu0 }
 0x3a5   : > { %v3734_v29 = vmax.f32 %v3670_v6, %v3702_v3  ;;  %v2480_v42 = vsel %vm1316_vm3, %v2478_v47, %v2479_v25  ;;  %v3496_v1 = vrot.slane %v2975_v24, 2 }
 0x3a6   : > { %v2554_v21 = vadd.f32 %v2480_v42, %v5394_v52 }
 0x3a7   : > { %v4333_v58 = vpack.c.bf16 %v3734_v29, %v3733_v34  ;;  %v3497_v52 = vsel %vm1316_vm3, %v3495_v55, %v3496_v1 }
 0x3a8   : > { %v2721_v5 = vpop.f32.mrf.mxu2  ;;  %v3059_v49 = vadd.f32 %v2719_v43, %v2554_v21 }
 0x3a9   : > { %4499 = vst [vmem:[%s5498_s12 + $0x58] sm:$0xff] %v4333_v58   ;;  %v2846_v39 = vpop.f32.mrf.mxu3 }
 0x3aa   : > { %v3240_v38 = vrot.slane %v2846_v39, 1  ;;  %v1961_v10 = vpop.f32.mrf.mxu1 }
 0x3ab   : > { %v2481_v62 = vrot.slane %v1961_v10, 2 }
 0x3ac   : > { %v2978_v4 = vpop.f32.mrf.mxu0  ;;  %v3241_v60 = vsel %vm1059_vm2, %v3239_v9, %v3240_v38 }
 0x3ad   : > { %v3315_v37 = vadd.f32 %v3241_v60, %v3059_v49  ;;  %v2482_v30 = vsel %vm1316_vm3, %v2479_v25, %v2481_v62  ;;  %v3498_v18 = vrot.slane %v2978_v4, 2 }
 0x3ae   : > { %v2555_v36 = vadd.f32 %v2482_v30, %v5398_v14 }
 0x3af   : > { %v3571_v50 = vadd.f32 %v3497_v52, %v3315_v37  ;;  %v3499_v33 = vsel %vm1316_vm3, %v3496_v1, %v3498_v18 }
 0x3b0   : > { %v2724_v27 = vpop.f32.mrf.mxu2  ;;  %v3060_v26 = vadd.f32 %v2721_v5, %v2555_v36 }
 0x3b1   : > { %v2849_v48 = vpop.f32.mrf.mxu3  ;;  %v3671_v0 = vadd.f32 %v5697_v16, %v3571_v50 }
 0x3b2   : > { %v3242_v7 = vrot.slane %v2849_v48, 1  ;;  %v1963_v46 = vpop.f32.mrf.mxu1 }
 0x3b3   : > { %v3703_v13 = vmul.f32 0.1, %v3671_v0  ;;  %v2483_v2 = vrot.slane %v1963_v46, 2 }
 0x3b4   : > { %v2980_v23 = vpop.f32.mrf.mxu0  ;;  %v3243_v32 = vsel %vm1059_vm2, %v3240_v38, %v3242_v7 }
 0x3b5   : > { %v3316_v17 = vadd.f32 %v3243_v32, %v3060_v26  ;;  %v3735_v15 = vmax.f32 %v3671_v0, %v3703_v13  ;;  %v3500_v42 = vrot.slane %v2980_v23, 2 }
 0x3b7   : > { %v3572_v40 = vadd.f32 %v3499_v33, %v3316_v17 }
 0x3b8   : > { %v2725_v14 = vpop.f32.mrf.mxu2 }
 0x3b9   : > { %v3672_v63 = vadd.f32 %v5697_v16, %v3572_v40  ;;  %v2851_v45 = vpop.f32.mrf.mxu3 }
 0x3ba   : > { %v1966_v44 = vpop.f32.mrf.mxu1  ;;  %v3244_v54 = vrot.slane %v2851_v45, 1 }
 0x3bb   : > { %v3704_v61 = vmul.f32 0.1, %v3672_v63  ;;  %v2484_v19 = vrot.slane %v1966_v44, 2 }
 0x3bc   : > { %v2983_v41 = vpop.f32.mrf.mxu0 }
 0x3bd   : > { %v3736_v28 = vmax.f32 %v3672_v63, %v3704_v61  ;;  %v2485_v59 = vsel %vm1316_vm3, %v2483_v2, %v2484_v19  ;;  %v3501_v25 = vrot.slane %v2983_v41, 2 }
 0x3be   : > { %v2556_v53 = vadd.f32 %v2485_v59, %v5412_v56 }
 0x3bf   : > { %v4338_v51 = vpack.c.bf16 %v3736_v28, %v3735_v15  ;;  %v3502_v56 = vsel %vm1316_vm3, %v3500_v42, %v3501_v25 }
 0x3c0   : > { %v2728_v11 = vpop.f32.mrf.mxu2  ;;  %v3061_v20 = vadd.f32 %v2725_v14, %v2556_v53 }
 0x3c1   : > { %4500 = vst [vmem:[%s5498_s12 + $0x60] sm:$0xff] %v4338_v51   ;;  %v2854_v43 = vpop.f32.mrf.mxu3 }
 0x3c2   : > { %v3245_v6 = vrot.slane %v2854_v43, 1  ;;  %v1968_v22 = vpop.f32.mrf.mxu1 }
 0x3c3   : > { %v2486_v3 = vrot.slane %v1968_v22, 2 }
 0x3c4   : > { %v2985_v47 = vpop.f32.mrf.mxu0  ;;  %v3246_v24 = vsel %vm1059_vm2, %v3244_v54, %v3245_v6 }
 0x3c5   : > { %v3317_v34 = vadd.f32 %v3246_v24, %v3061_v20  ;;  %v2487_v29 = vsel %vm1316_vm3, %v2484_v19, %v2486_v3  ;;  %v3503_v9 = vrot.slane %v2985_v47, 2 }
 0x3c6   : > { %v2557_v58 = vadd.f32 %v2487_v29, %v5422_v35 }
 0x3c7   : > { %v3573_v5 = vadd.f32 %v3502_v56, %v3317_v34  ;;  %v3504_v60 = vsel %vm1316_vm3, %v3501_v25, %v3503_v9 }
 0x3c8   : > { %v2730_v21 = vpop.f32.mrf.mxu2  ;;  %v3062_v49 = vadd.f32 %v2728_v11, %v2557_v58 }
 0x3c9   : > { %v2856_v39 = vpop.f32.mrf.mxu3  ;;  %v3673_v55 = vadd.f32 %v5697_v16, %v3573_v5 }
 0x3ca   : > { %v3247_v38 = vrot.slane %v2856_v39, 1  ;;  %v1971_v10 = vpop.f32.mrf.mxu1 }
 0x3cb   : > { %v3705_v30 = vmul.f32 0.1, %v3673_v55  ;;  %v2488_v48 = vrot.slane %v1971_v10, 2 }
 0x3cc   : > { %v2988_v62 = vpop.f32.mrf.mxu0  ;;  %v3248_v4 = vsel %vm1059_vm2, %v3245_v6, %v3247_v38 }
 0x3cd   : > { %v3318_v1 = vadd.f32 %v3248_v4, %v3062_v49  ;;  %v3737_v46 = vmax.f32 %v3673_v55, %v3705_v30  ;;  %v3505_v61 = vrot.slane %v2988_v62, 2 }
 0x3cf   : > { %v3574_v37 = vadd.f32 %v3504_v60, %v3318_v1 }
 0x3d0   : > { %v2732_v35 = vpop.f32.mrf.mxu2 }
 0x3d1   : > { %v3674_v36 = vadd.f32 %v5697_v16, %v3574_v37  ;;  %v2859_v52 = vpop.f32.mrf.mxu3 }
 0x3d2   : > { %v1973_v27 = vpop.f32.mrf.mxu1  ;;  %v3249_v40 = vrot.slane %v2859_v52, 1 }
 0x3d3   : > { %v3706_v50 = vmul.f32 0.1, %v3674_v36  ;;  %v2489_v18 = vrot.slane %v1973_v27, 2 }
 0x3d4   : > { %v2990_v7 = vpop.f32.mrf.mxu0 }
 0x3d5   : > { %v3738_v26 = vmax.f32 %v3674_v36, %v3706_v50  ;;  %v2490_v23 = vsel %vm1316_vm3, %v2488_v48, %v2489_v18  ;;  %v3506_v2 = vrot.slane %v2990_v7, 2 }
 0x3d6   : > { %v2558_v0 = vadd.f32 %v2490_v23, %v5436_v12 }
 0x3d7   : > { %v4343_v32 = vpack.c.bf16 %v3738_v26, %v3737_v46  ;;  %v3507_v12 = vsel %vm1316_vm3, %v3505_v61, %v3506_v2 }
 0x3d8   : > { %v2734_v17 = vpop.f32.mrf.mxu2  ;;  %v3063_v63 = vadd.f32 %v2732_v35, %v2558_v0 }
 0x3d9   : > { %4501 = vst [vmem:[%s5498_s12 + $0x68] sm:$0xff] %v4343_v32   ;;  %v2861_v33 = vpop.f32.mrf.mxu3 }
 0x3da   : > { %v3250_v14 = vrot.slane %v2861_v33, 1  ;;  %v1976_v13 = vpop.f32.mrf.mxu1 }
 0x3db   : > { %v2491_v45 = vrot.slane %v1976_v13, 2 }
 0x3dc   : > { %v2993_v44 = vpop.f32.mrf.mxu0  ;;  %v3251_v19 = vsel %vm1059_vm2, %v3249_v40, %v3250_v14 }
 0x3dd   : > { %v3319_v41 = vadd.f32 %v3251_v19, %v3063_v63  ;;  %v2492_v15 = vsel %vm1316_vm3, %v2489_v18, %v2491_v45  ;;  %v3508_v11 = vrot.slane %v2993_v44, 2 }
 0x3de   : > { %v2559_v28 = vadd.f32 %v2492_v15, %v5440_v57 }
 0x3df   : > { %v3575_v51 = vadd.f32 %v3507_v12, %v3319_v41  ;;  %v3509_v25 = vsel %vm1316_vm3, %v3506_v2, %v3508_v11 }
 0x3e0   : > { %v2737_v59 = vpop.f32.mrf.mxu2  ;;  %v3064_v6 = vadd.f32 %v2734_v17, %v2559_v28 }
 0x3e1   : > { %v2864_v53 = vpop.f32.mrf.mxu3  ;;  %v3675_v3 = vadd.f32 %v5697_v16, %v3575_v51 }
 0x3e2   : > { %v3252_v43 = vrot.slane %v2864_v53, 1  ;;  %v1978_v54 = vpop.f32.mrf.mxu1 }
 0x3e3   : > { %v3707_v34 = vmul.f32 0.1, %v3675_v3  ;;  %v2493_v21 = vrot.slane %v1978_v54, 2 }
 0x3e4   : > { %v2995_v22 = vpop.f32.mrf.mxu0  ;;  %v3253_v20 = vsel %vm1059_vm2, %v3250_v14, %v3252_v43 }
 0x3e5   : > { %v3320_v47 = vadd.f32 %v3253_v20, %v3064_v6  ;;  %v3739_v39 = vmax.f32 %v3675_v3, %v3707_v34  ;;  %v3510_v48 = vrot.slane %v2995_v22, 2 }
 0x3e7   : > { %v3576_v24 = vadd.f32 %v3509_v25, %v3320_v47 }
 0x3e8   : > { %v2738_v57 = vpop.f32.mrf.mxu2 }
 0x3e9   : > { %v3676_v29 = vadd.f32 %v5697_v16, %v3576_v24  ;;  %v2866_v42 = vpop.f32.mrf.mxu3 }
 0x3ea   : > { %v1981_v58 = vpop.f32.mrf.mxu1  ;;  %v3254_v1 = vrot.slane %v2866_v42, 1 }
 0x3eb   : > { %v3708_v56 = vmul.f32 0.1, %v3676_v29  ;;  %v2494_v5 = vrot.slane %v1981_v58, 2 }
 0x3ec   : > { %v2998_v10 = vpop.f32.mrf.mxu0 }
 0x3ed   : > { %v3740_v9 = vmax.f32 %v3676_v29, %v3708_v56  ;;  %v2495_v38 = vsel %vm1316_vm3, %v2493_v21, %v2494_v5  ;;  %v3511_v36 = vrot.slane %v2998_v10, 2 }
 0x3ee   : > { %v2560_v62 = vadd.f32 %v2495_v38, %v5454_v8 }
 0x3ef   : > { %v4348_v49 = vpack.c.bf16 %v3740_v9, %v3739_v39  ;;  %v3512_v8 = vsel %vm1316_vm3, %v3510_v48, %v3511_v36 }
 0x3f0   : > { %v2741_v4 = vpop.f32.mrf.mxu2  ;;  %v3065_v35 = vadd.f32 %v2738_v57, %v2560_v62 }
 0x3f1   : > { %4502 = vst [vmem:[%s5498_s12 + $0x70] sm:$0xff] %v4348_v49   ;;  %v2869_v55 = vpop.f32.mrf.mxu3 }
 0x3f2   : > { %v3255_v60 = vrot.slane %v2869_v55, 1  ;;  %v1983_v37 = vpop.f32.mrf.mxu1 }
 0x3f3   : > { %v2496_v30 = vrot.slane %v1983_v37, 2 }
 0x3f4   : > { %v3256_v52 = vsel %vm1059_vm2, %v3254_v1, %v3255_v60  ;;  %v3000_v7 = vpop.f32.mrf.mxu0 }
 0x3f5   : > { %v3321_v27 = vadd.f32 %v3256_v52, %v3065_v35  ;;  %v2497_v50 = vsel %vm1316_vm3, %v2494_v5, %v2496_v30  ;;  %v3513_v32 = vrot.slane %v3000_v7, 2 }
 0x3f6   : > { %v2561_v18 = vadd.f32 %v2497_v50, %v5464_v31 }
 0x3f7   : > { %v3577_v26 = vadd.f32 %v3512_v8, %v3321_v27  ;;  %v3514_v31 = vsel %vm1316_vm3, %v3511_v36, %v3513_v32 }
 0x3f8   : > { %v2743_v46 = vpop.f32.mrf.mxu2  ;;  %v3066_v17 = vadd.f32 %v2741_v4, %v2561_v18 }
 0x3f9   : > { %v2871_v23 = vpop.f32.mrf.mxu3  ;;  %v3677_v40 = vadd.f32 %v5697_v16, %v3577_v26 }
 0x3fa   : > { %v3257_v0 = vrot.slane %v2871_v23, 1 }
 0x3fb   : > { %v3709_v63 = vmul.f32 0.1, %v3677_v40 }
 0x3fc   : > { %v3258_v33 = vsel %vm1059_vm2, %v3255_v60, %v3257_v0 }
 0x3fd   : > { %v3322_v14 = vadd.f32 %v3258_v33, %v3066_v17  ;;  %v3741_v61 = vmax.f32 %v3677_v40, %v3709_v63 }
 0x3ff   : > { %v3578_v13 = vadd.f32 %v3514_v31, %v3322_v14 }
 0x401   : > { %v3678_v45 = vadd.f32 %v5697_v16, %v3578_v13 }
 0x403   : > { %v3710_v44 = vmul.f32 0.1, %v3678_v45 }
 0x405   : > { %v3742_v2 = vmax.f32 %v3678_v45, %v3710_v44 }
 0x407   : > { %v4353_v19 = vpack.c.bf16 %v3742_v2, %v3741_v61 }
 0x409   : > { %4503 = vst [vmem:[%s5498_s12 + $0x78] sm:$0xff] %v4353_v19  }
 0x40a   : > { %4700 = shalt.err (!%p4697_p5)
}
 0x40b   : > { %s4753_s10 = smov 64   ;;  %s4754_s12 = smov 4  }
 0x40c   : > { %4567 = dma.vmem_to_hbm [thread:$0]  (%p4820_p4), %s3824_s29, 2048, %s3826_s30, %s3808_s18, %s4753_s10, %s4753_s10, %s4754_s12  }
 0x40d PF: > { %p4574_p6 = scmp.ge.s32.totalorder %s4751_s20, 2  ;;  %s3840_s14 = sand.u32 1, %s4731_s15  }
 0x40e   : > { %s3841_s21 = scalar_lea.sflag [#allocation4], %s3840_s14 }
 0x40f   : > { %p4570_p7 = pnand %p4574_p6, %p4827_p8 }
 0x411   : > { %p4571_p9 = pneg %p4570_p7 }
 0x413   : > { %4726 = dma.done.wait (%p4571_p9), %s3841_s21, 2048  }
 0x414   : > { %4728 = vsyncadd (%p4571_p9), %s3841_s21, 4294965248  ;;  %s17_s20 = sadd.s32 1, %s4751_s20   ;;  %s5799_s15 = smov %s4735_s16 }
 0x415   : > { %p14_p10 = scmp.ge.s32.totalorder %s17_s20, 4   ;;  %s5800_s16 = smov %s4739_s17 }
 0x416   : > { %s5801_s17 = smov %s4833_s28  ;;  %s5802_s18 = smov %s4747_s19 }
 0x417   : > { %s5803_s19 = smov %s5805_s23  ;;  %16 = sbr.rel (!%p14_p10) target bundleno = 4 (0x4), region = 76 }
 0x41c   :  { %3847 = vsyncpa [#allocation4], 1 }
 0x41d   :  { %3849 = vsyncpa [#allocation4 + $0x1], 1 }

</bundles_post_ra>
